<compile_context>
chip_gen: v6e
topology: v6e:2x2x1
jax: 0.10.0
libtpu: 0.0.40
codegen_flags: <defaults>
</compile_context>

<pallas_src>
import functools

import jax
import jax.numpy as jnp
from jax.experimental import pallas as pl
from jax.experimental.pallas import tpu as pltpu


def _round_up(x, m):
    return ((x + m - 1) // m) * m


# Scoped-VMEM budget that is safe on v5e (128 MiB phys), v6e (128 MiB) and
# v7x (64 MiB phys / 32 MiB scoped default).  Our per-step buffering is ~2 MiB.
_VMEM_LIMIT_BYTES = 32 * 1024 * 1024


# ----------------------------------------------------------------------------
# Pallas kernels
# ----------------------------------------------------------------------------
def _matmul_kernel(a_ref, w_ref, o_ref, acc_ref, *, leaky_slope):
    """Tiled o = A @ W with f32 accumulator; optional fused LeakyReLU epilogue."""

    @pl.when(pl.program_id(2) == 0)
    def _():
        acc_ref[...] = jnp.zeros_like(acc_ref)

    acc_ref[...] += jnp.dot(a_ref[...], w_ref[...], preferred_element_type=jnp.float32)

    @pl.when(pl.program_id(2) == pl.num_programs(2) - 1)
    def _():
        acc = acc_ref[...]
        if leaky_slope is not None:                     # static Python branch
            acc = jnp.where(acc > 0, acc, leaky_slope * acc)
        o_ref[...] = acc.astype(o_ref.dtype)


def _matmul_bias_kernel(a_ref, w_ref, b_ref, o_ref, acc_ref):
    """Tiled o = A @ W + b (bias broadcast over rows; used by the final conv)."""

    @pl.when(pl.program_id(2) == 0)
    def _():
        acc_ref[...] = jnp.zeros_like(acc_ref)

    acc_ref[...] += jnp.dot(a_ref[...], w_ref[...], preferred_element_type=jnp.float32)

    @pl.when(pl.program_id(2) == pl.num_programs(2) - 1)
    def _():
        o_ref[...] = (acc_ref[...] + b_ref[...]).astype(o_ref.dtype)


def _instnorm_leaky_kernel(x_ref, o_ref, *, eps, slope):
    """Per-(n, c) instance norm over the spatial axis, then LeakyReLU.

    Block shape: (1, H*W, c_tile).  One-pass statistics (E[x^2] - mean^2,
    clamped at 0) in f32.  Matches torch.nn.InstanceNorm2d defaults:
    affine=False, biased variance, eps=1e-5, no running stats.
    """
    x = x_ref[...]                                      # (1, HW, tc) f32
    mean = jnp.mean(x, axis=1, keepdims=True)           # (1, 1, tc)
    ex2 = jnp.mean(x * x, axis=1, keepdims=True)
    var = jnp.maximum(ex2 - mean * mean, 0.0)
    y = (x - mean) * jax.lax.rsqrt(var + eps)
    o_ref[...] = jnp.where(y > 0, y, slope * y).astype(o_ref.dtype)


# ----------------------------------------------------------------------------
# Tiled Pallas matmul wrapper (handles padding / tile selection)
# ----------------------------------------------------------------------------
def _matmul_pallas(patches, wmat, *, leaky_slope=None, bias=None):
    """(M, K) @ (K, Cout) -> (M, Cout) f32, tiled on the MXU.

    Operands are cast to bf16 (f32 accumulation).  M is padded to a multiple
    of the row tile, K and Cout to multiples of 128 lanes (zero padding is
    exact: extra rows/cols contribute nothing and are sliced off).
    """
    M, K = patches.shape
    K2, Cout = wmat.shape
    assert K == K2

    Kp = _round_up(K, 128)
    Coutp = _round_up(Cout, 128)

    # Tile selection (conservative for v7x's 64 MiB VMEM; fine on v5e/v6e).
    tm = 512 if M >= 512 else _round_up(M, 8)
    Mp = _round_up(M, tm)
    if Kp % 512 == 0:
        tk = 512
    elif Kp % 256 == 0:
        tk = 256
    else:
        tk = 128
    tn = 256 if Coutp % 256 == 0 else 128   # wider tn amortizes v5e's single vst slot

    a = jnp.zeros((Mp, Kp), jnp.bfloat16).at[:M, :K].set(patches.astype(jnp.bfloat16))
    w = jnp.zeros((Kp, Coutp), jnp.bfloat16).at[:K, :Cout].set(wmat.astype(jnp.bfloat16))

    grid = (Mp // tm, Coutp // tn, Kp // tk)
    a_spec = pl.BlockSpec((tm, tk), lambda i, j, k: (i, k))
    w_spec = pl.BlockSpec((tk, tn), lambda i, j, k: (k, j))
    o_spec = pl.BlockSpec((tm, tn), lambda i, j, k: (i, j))
    scratch = [pltpu.VMEM((tm, tn), jnp.float32)]
    out_shape = jax.ShapeDtypeStruct((Mp, Coutp), jnp.float32)
    cparams = pltpu.CompilerParams(
        dimension_semantics=("parallel", "parallel", "arbitrary"),
        vmem_limit_bytes=_VMEM_LIMIT_BYTES,
    )

    if bias is None:
        kern = functools.partial(_matmul_kernel, leaky_slope=leaky_slope)
        y = pl.pallas_call(
            kern,
            out_shape=out_shape,
            grid_spec=pltpu.PrefetchScalarGridSpec(
                num_scalar_prefetch=0,
                grid=grid,
                in_specs=[a_spec, w_spec],
                out_specs=o_spec,
                scratch_shapes=scratch,
            ),
            compiler_params=cparams,
        )(a, w)
    else:
        b = jnp.zeros((1, Coutp), jnp.float32).at[0, :Cout].set(bias.astype(jnp.float32))
        b_spec = pl.BlockSpec((1, tn), lambda i, j, k: (0, j))
        y = pl.pallas_call(
            _matmul_bias_kernel,
            out_shape=out_shape,
            grid_spec=pltpu.PrefetchScalarGridSpec(
                num_scalar_prefetch=0,
                grid=grid,
                in_specs=[a_spec, w_spec, b_spec],
                out_specs=o_spec,
                scratch_shapes=scratch,
            ),
            compiler_params=cparams,
        )(a, w, b)

    return y[:M, :Cout]


# ----------------------------------------------------------------------------
# Conv / norm wrappers (im2col glue in plain JAX, hot loops in Pallas)
# ----------------------------------------------------------------------------
def conv2d_pallas(x_nhwc, w_oihw, *, stride, pad, leaky_slope=None, bias=None):
    """Conv2d (4x4 here) via im2col + tiled Pallas matmul.

    x_nhwc : (N, H, W, Cin) float32
    w_oihw : (Cout, Cin, KH, KW) float32  (PyTorch weight layout)
    """
    N, H, W, Cin = x_nhwc.shape
    Cout, _, KH, KW = w_oihw.shape
    OH = (H + 2 * pad - KH) // stride + 1
    OW = (W + 2 * pad - KW) // stride + 1

    xp = jnp.pad(x_nhwc, ((0, 0), (pad, pad), (pad, pad), (0, 0)))

    # im2col: patch ordering is (kh, kw, cin) -> matches weight reshape below.
    cols = []
    for kh in range(KH):
        for kw in range(KW):
            cols.append(
                xp[:, kh : kh + stride * OH : stride, kw : kw + stride * OW : stride, :]
            )
    patches = jnp.concatenate(cols, axis=-1).reshape(N * OH * OW, KH * KW * Cin)

    wmat = jnp.transpose(w_oihw, (2, 3, 1, 0)).reshape(KH * KW * Cin, Cout)

    y = _matmul_pallas(patches, wmat, leaky_slope=leaky_slope, bias=bias)
    return y.reshape(N, OH, OW, Cout)


def instnorm_leaky_pallas(x_nhwc, *, eps=1e-5, slope=0.2):
    """Fused InstanceNorm2d + LeakyReLU(slope) on an NHWC tensor."""
    N, H, W, C = x_nhwc.shape
    HW = H * W
    x = x_nhwc.reshape(N, HW, C)

    # Channel tiling: lane-dense 128-wide tiles when possible, else full C.
    tc = 128 if C % 128 == 0 else C
    grid = (N, C // tc)

    kern = functools.partial(_instnorm_leaky_kernel, eps=eps, slope=slope)
    y = pl.pallas_call(
        kern,
        out_shape=jax.ShapeDtypeStruct((N, HW, C), jnp.float32),
        grid=grid,
        in_specs=[pl.BlockSpec((1, HW, tc), lambda i, j: (i, 0, j))],
        out_specs=pl.BlockSpec((1, HW, tc), lambda i, j: (i, 0, j)),
        compiler_params=pltpu.CompilerParams(
            dimension_semantics=("parallel", "parallel"),
            vmem_limit_bytes=_VMEM_LIMIT_BYTES,
        ),
    )(x)
    return y.reshape(N, H, W, C)


# ----------------------------------------------------------------------------
# Discriminator_Patch forward (jitted so im2col/padding fuse with the kernels)
# ----------------------------------------------------------------------------
def _forward(params, x_nchw):
    w1, w2, w3, w4, w5, b5 = params
    # layout: accept NCHW (PyTorch), compute in NHWC, return NCHW.
    x = jnp.transpose(x_nchw.astype(jnp.float32), (0, 2, 3, 1))

    x = conv2d_pallas(x, w1, stride=2, pad=1, leaky_slope=0.2)

    x = conv2d_pallas(x, w2, stride=2, pad=1)
    x = instnorm_leaky_pallas(x)

    x = conv2d_pallas(x, w3, stride=2, pad=1)
    x = instnorm_leaky_pallas(x)

    x = conv2d_pallas(x, w4, stride=1, pad=1)
    x = instnorm_leaky_pallas(x)

    x = conv2d_pallas(x, w5, stride=1, pad=1, bias=b5)

    return jnp.transpose(x, (0, 3, 1, 2))  # back to NCHW


_forward_jit = jax.jit(_forward)


class DiscriminatorPatchPallas:
    """PatchGAN discriminator, mirroring the PyTorch module's forward pass.

    Sequential:
      Conv(inC -> pm,   k4 s2 p1, no bias) + LeakyReLU(0.2)
      Conv(pm  -> 2pm,  k4 s2 p1, no bias) + InstanceNorm + LeakyReLU(0.2)
      Conv(2pm -> 4pm,  k4 s2 p1, no bias) + InstanceNorm + LeakyReLU(0.2)
      Conv(4pm -> 8pm,  k4 s1 p1, no bias) + InstanceNorm + LeakyReLU(0.2)
      Conv(8pm -> outC, k4 s1 p1, bias)
    (The PyTorch module passes pm*4 to the 4th InstanceNorm2d, but with
     affine=False that argument is irrelevant — normalization is per-channel
     over the actual 8*pm channels, which is what we do here.)
    """

    def __init__(self, inchannels=3, outchannels=1, pm=64, key=None):
        if key is None:
            key = jax.random.PRNGKey(0)
        k = jax.random.split(key, 6)

        def winit(kk, cout, cin):
            # Deterministic synthetic init (roughly PyTorch-scale fan-in scaling).
            scale = 1.0 / jnp.sqrt(jnp.float32(cin * 16))
            return scale * jax.random.normal(kk, (cout, cin, 4, 4), jnp.float32)

        self.params = (
            winit(k[0], pm * 1, inchannels),
            winit(k[1], pm * 2, pm * 1),
            winit(k[2], pm * 4, pm * 2),
            winit(k[3], pm * 8, pm * 4),
            winit(k[4], outchannels, pm * 8),
            0.01 * jax.random.normal(k[5], (outchannels,), jnp.float32),
        )

    def __call__(self, x_nchw):
        return _forward_jit(self.params, x_nchw)


# ----------------------------------------------------------------------------
# Demo
# ----------------------------------------------------------------------------
if __name__ == "__main__":
    key = jax.random.PRNGKey(0)
    k_in, k_params = jax.random.split(key)

    # Small shapes consistent with the module: NCHW input, pm reduced to 8.
    N, C, H, W = 2, 3, 32, 32
    x = jax.random.normal(k_in, (N, C, H, W), jnp.float32)

    model = DiscriminatorPatchPallas(inchannels=C, outchannels=1, pm=8, key=k_params)

    out = model(x)
    out = jax.block_until_ready(out)

    # Expected output spatial path: 32 -> 16 -> 8 -> 4 -> 3 -> 2, shape (2, 1, 2, 2).
    assert out.shape == (2, 1, 2, 2), out.shape
    assert jnp.all(jnp.isfinite(out))
    print("KERNEL_OK")
</pallas_src>

<mosaic_0001>
module attributes {stable_mosaic.version = 11 : i64} {
  func.func @_matmul_kernel(%arg0: i32, %arg1: i32, %arg2: i32, %arg3: memref<512x128xbf16, #tpu.memory_space<vmem>>, %arg4: memref<128x128xbf16, #tpu.memory_space<vmem>>, %arg5: memref<512x128xf32, #tpu.memory_space<vmem>>, %arg6: memref<512x128xf32, #tpu.memory_space<vmem>>) attributes {dimension_semantics = [#tpu.dimension_semantics<parallel>, #tpu.dimension_semantics<parallel>, #tpu.dimension_semantics<arbitrary>], iteration_bounds = array<i64: 1, 1, 1>, scalar_prefetch = 0 : i64, scratch_operands = 1 : i64, tpu.core_type = #tpu.core_type<tc>, window_params = [{transform_indices = @transform_0, window_bounds = array<i64: 512, 128>}, {transform_indices = @transform_1, window_bounds = array<i64: 128, 128>}, {transform_indices = @transform_2, window_bounds = array<i64: 512, 128>}]} {
    %c0_i32 = arith.constant 0 : i32
    %0 = arith.cmpi eq, %arg2, %c0_i32 : i32
    %1 = arith.extui %0 : i1 to i32
    %c0_i32_0 = arith.constant 0 : i32
    %2 = arith.cmpi ne, %1, %c0_i32_0 : i32
    scf.if %2 {
      %cst_10 = arith.constant 0.000000e+00 : f32
      %12 = vector.broadcast %cst_10 : f32 to vector<512x128xf32>
      %c0_11 = arith.constant 0 : index
      %c0_12 = arith.constant 0 : index
      %13 = vector.load %arg6[%c0_11, %c0_12] : memref<512x128xf32, #tpu.memory_space<vmem>>, vector<512x128xf32>
      tpu.vector_store %arg6[%c0_11, %c0_12], %12 {strides = array<i32>} : memref<512x128xf32, #tpu.memory_space<vmem>>, vector<512x128xf32>,
    } else {
    }
    %c0 = arith.constant 0 : index
    %c0_1 = arith.constant 0 : index
    %3 = vector.load %arg6[%c0, %c0_1] : memref<512x128xf32, #tpu.memory_space<vmem>>, vector<512x128xf32>
    %c0_2 = arith.constant 0 : index
    %c0_3 = arith.constant 0 : index
    %4 = vector.load %arg3[%c0_2, %c0_3] : memref<512x128xbf16, #tpu.memory_space<vmem>>, vector<512x128xbf16>
    %c0_4 = arith.constant 0 : index
    %c0_5 = arith.constant 0 : index
    %5 = vector.load %arg4[%c0_4, %c0_5] : memref<128x128xbf16, #tpu.memory_space<vmem>>, vector<128x128xbf16>
    %cst = arith.constant dense<0.000000e+00> : vector<512x128xf32>
    %6 = tpu.matmul %4, %5, %cst {dimension_numbers = #tpu.dot_dimension_numbers<[1], [0], [0], [1], [0, 0, 1, 1], [], []>} : vector<512x128xbf16>, vector<128x128xbf16>, vector<512x128xf32> -> vector<512x128xf32>
    %7 = arith.addf %3, %6 : vector<512x128xf32>
    %c0_6 = arith.constant 0 : index
    %c0_7 = arith.constant 0 : index
    %8 = vector.load %arg6[%c0_6, %c0_7] : memref<512x128xf32, #tpu.memory_space<vmem>>, vector<512x128xf32>
    tpu.vector_store %arg6[%c0_6, %c0_7], %7 {strides = array<i32>} : memref<512x128xf32, #tpu.memory_space<vmem>>, vector<512x128xf32>,
    %c0_i32_8 = arith.constant 0 : i32
    %9 = arith.cmpi eq, %arg2, %c0_i32_8 : i32
    %10 = arith.extui %9 : i1 to i32
    %c0_i32_9 = arith.constant 0 : i32
    %11 = arith.cmpi ne, %10, %c0_i32_9 : i32
    scf.if %11 {
      %c0_10 = arith.constant 0 : index
      %c0_11 = arith.constant 0 : index
      %12 = vector.load %arg6[%c0_10, %c0_11] : memref<512x128xf32, #tpu.memory_space<vmem>>, vector<512x128xf32>
      %cst_12 = arith.constant 0.000000e+00 : f32
      %13 = vector.broadcast %cst_12 : f32 to vector<512x128xf32>
      %14 = arith.cmpf ogt, %12, %13 : vector<512x128xf32>
      %cst_13 = arith.constant 2.000000e-01 : f32
      %15 = vector.broadcast %cst_13 : f32 to vector<512x128xf32>
      %16 = arith.mulf %15, %12 : vector<512x128xf32>
      %17 = arith.select %14, %12, %16 : vector<512x128xi1>, vector<512x128xf32>
      %c0_14 = arith.constant 0 : index
      %c0_15 = arith.constant 0 : index
      %18 = vector.load %arg5[%c0_14, %c0_15] : memref<512x128xf32, #tpu.memory_space<vmem>>, vector<512x128xf32>
      tpu.vector_store %arg5[%c0_14, %c0_15], %17 {strides = array<i32>} : memref<512x128xf32, #tpu.memory_space<vmem>>, vector<512x128xf32>,
    } else {
    }
    return
  }
  func.func @transform_0(%arg0: i32, %arg1: i32, %arg2: i32) -> (i32, i32) {
    %c0_i32 = arith.constant 0 : i32
    return %arg0, %arg2 : i32, i32
  }
  func.func @transform_1(%arg0: i32, %arg1: i32, %arg2: i32) -> (i32, i32) {
    %c0_i32 = arith.constant 0 : i32
    return %arg2, %arg1 : i32, i32
  }
  func.func @transform_2(%arg0: i32, %arg1: i32, %arg2: i32) -> (i32, i32) {
    %c0_i32 = arith.constant 0 : i32
    return %arg0, %arg1 : i32, i32
  }
}

module attributes {stable_mosaic.version = 11 : i64} {
  func.func @_matmul_kernel(%arg0: i32, %arg1: i32, %arg2: i32, %arg3: memref<128x128xbf16, #tpu.memory_space<vmem>>, %arg4: memref<128x128xbf16, #tpu.memory_space<vmem>>, %arg5: memref<128x128xf32, #tpu.memory_space<vmem>>, %arg6: memref<128x128xf32, #tpu.memory_space<vmem>>) attributes {dimension_semantics = [#tpu.dimension_semantics<parallel>, #tpu.dimension_semantics<parallel>, #tpu.dimension_semantics<arbitrary>], iteration_bounds = array<i64: 1, 1, 1>, scalar_prefetch = 0 : i64, scratch_operands = 1 : i64, tpu.core_type = #tpu.core_type<tc>, window_params = [{transform_indices = @transform_0, window_bounds = array<i64: 128, 128>}, {transform_indices = @transform_1, window_bounds = array<i64: 128, 128>}, {transform_indices = @transform_2, window_bounds = array<i64: 128, 128>}]} {
    %c0_i32 = arith.constant 0 : i32
    %0 = arith.cmpi eq, %arg2, %c0_i32 : i32
    %1 = arith.extui %0 : i1 to i32
    %c0_i32_0 = arith.constant 0 : i32
    %2 = arith.cmpi ne, %1, %c0_i32_0 : i32
    scf.if %2 {
      %cst_10 = arith.constant 0.000000e+00 : f32
      %12 = vector.broadcast %cst_10 : f32 to vector<128x128xf32>
      %c0_11 = arith.constant 0 : index
      %c0_12 = arith.constant 0 : index
      %13 = vector.load %arg6[%c0_11, %c0_12] : memref<128x128xf32, #tpu.memory_space<vmem>>, vector<128x128xf32>
      tpu.vector_store %arg6[%c0_11, %c0_12], %12 {strides = array<i32>} : memref<128x128xf32, #tpu.memory_space<vmem>>, vector<128x128xf32>,
    } else {
    }
    %c0 = arith.constant 0 : index
    %c0_1 = arith.constant 0 : index
    %3 = vector.load %arg6[%c0, %c0_1] : memref<128x128xf32, #tpu.memory_space<vmem>>, vector<128x128xf32>
    %c0_2 = arith.constant 0 : index
    %c0_3 = arith.constant 0 : index
    %4 = vector.load %arg3[%c0_2, %c0_3] : memref<128x128xbf16, #tpu.memory_space<vmem>>, vector<128x128xbf16>
    %c0_4 = arith.constant 0 : index
    %c0_5 = arith.constant 0 : index
    %5 = vector.load %arg4[%c0_4, %c0_5] : memref<128x128xbf16, #tpu.memory_space<vmem>>, vector<128x128xbf16>
    %cst = arith.constant dense<0.000000e+00> : vector<128x128xf32>
    %6 = tpu.matmul %4, %5, %cst {dimension_numbers = #tpu.dot_dimension_numbers<[1], [0], [0], [1], [0, 0, 1, 1], [], []>} : vector<128x128xbf16>, vector<128x128xbf16>, vector<128x128xf32> -> vector<128x128xf32>
    %7 = arith.addf %3, %6 : vector<128x128xf32>
    %c0_6 = arith.constant 0 : index
    %c0_7 = arith.constant 0 : index
    %8 = vector.load %arg6[%c0_6, %c0_7] : memref<128x128xf32, #tpu.memory_space<vmem>>, vector<128x128xf32>
    tpu.vector_store %arg6[%c0_6, %c0_7], %7 {strides = array<i32>} : memref<128x128xf32, #tpu.memory_space<vmem>>, vector<128x128xf32>,
    %c0_i32_8 = arith.constant 0 : i32
    %9 = arith.cmpi eq, %arg2, %c0_i32_8 : i32
    %10 = arith.extui %9 : i1 to i32
    %c0_i32_9 = arith.constant 0 : i32
    %11 = arith.cmpi ne, %10, %c0_i32_9 : i32
    scf.if %11 {
      %c0_10 = arith.constant 0 : index
      %c0_11 = arith.constant 0 : index
      %12 = vector.load %arg6[%c0_10, %c0_11] : memref<128x128xf32, #tpu.memory_space<vmem>>, vector<128x128xf32>
      %c0_12 = arith.constant 0 : index
      %c0_13 = arith.constant 0 : index
      %13 = vector.load %arg5[%c0_12, %c0_13] : memref<128x128xf32, #tpu.memory_space<vmem>>, vector<128x128xf32>
      tpu.vector_store %arg5[%c0_12, %c0_13], %12 {strides = array<i32>} : memref<128x128xf32, #tpu.memory_space<vmem>>, vector<128x128xf32>,
    } else {
    }
    return
  }
  func.func @transform_0(%arg0: i32, %arg1: i32, %arg2: i32) -> (i32, i32) {
    %c0_i32 = arith.constant 0 : i32
    return %arg0, %arg2 : i32, i32
  }
  func.func @transform_1(%arg0: i32, %arg1: i32, %arg2: i32) -> (i32, i32) {
    %c0_i32 = arith.constant 0 : i32
    return %arg2, %arg1 : i32, i32
  }
  func.func @transform_2(%arg0: i32, %arg1: i32, %arg2: i32) -> (i32, i32) {
    %c0_i32 = arith.constant 0 : i32
    return %arg0, %arg1 : i32, i32
  }
}

module attributes {stable_mosaic.version = 11 : i64} {
  func.func @_instnorm_leaky_kernel(%arg0: i32, %arg1: i32, %arg2: memref<1x64x16xf32, #tpu.memory_space<vmem>>, %arg3: memref<1x64x16xf32, #tpu.memory_space<vmem>>) attributes {dimension_semantics = [#tpu.dimension_semantics<parallel>, #tpu.dimension_semantics<parallel>], iteration_bounds = array<i64: 2, 1>, scalar_prefetch = 0 : i64, scratch_operands = 0 : i64, tpu.core_type = #tpu.core_type<tc>, window_params = [{transform_indices = @transform_0, window_bounds = array<i64: 1, 64, 16>}, {transform_indices = @transform_1, window_bounds = array<i64: 1, 64, 16>}]} {
    %c0 = arith.constant 0 : index
    %c0_0 = arith.constant 0 : index
    %c0_1 = arith.constant 0 : index
    %0 = vector.load %arg2[%c0, %c0_0, %c0_1] : memref<1x64x16xf32, #tpu.memory_space<vmem>>, vector<1x64x16xf32>
    %cst = arith.constant dense<0.000000e+00> : vector<1x16xf32>
    %1 = vector.multi_reduction <add>, %0, %cst [1] : vector<1x64x16xf32> to vector<1x16xf32>
    %2 = vector.shape_cast %1 : vector<1x16xf32> to vector<1x1x16xf32>
    %cst_2 = arith.constant 6.400000e+01 : f32
    %3 = vector.broadcast %cst_2 : f32 to vector<1x1x16xf32>
    %4 = arith.divf %2, %3 : vector<1x1x16xf32>
    %5 = arith.mulf %0, %0 : vector<1x64x16xf32>
    %cst_3 = arith.constant dense<0.000000e+00> : vector<1x16xf32>
    %6 = vector.multi_reduction <add>, %5, %cst_3 [1] : vector<1x64x16xf32> to vector<1x16xf32>
    %7 = vector.shape_cast %6 : vector<1x16xf32> to vector<1x1x16xf32>
    %cst_4 = arith.constant 6.400000e+01 : f32
    %8 = vector.broadcast %cst_4 : f32 to vector<1x1x16xf32>
    %9 = arith.divf %7, %8 : vector<1x1x16xf32>
    %10 = arith.mulf %4, %4 : vector<1x1x16xf32>
    %11 = arith.subf %9, %10 : vector<1x1x16xf32>
    %cst_5 = arith.constant 0.000000e+00 : f32
    %12 = vector.broadcast %cst_5 : f32 to vector<1x1x16xf32>
    %13 = arith.maximumf %11, %12 : vector<1x1x16xf32>
    %14 = vector.broadcast %4 : vector<1x1x16xf32> to vector<1x64x16xf32>
    %15 = arith.subf %0, %14 : vector<1x64x16xf32>
    %cst_6 = arith.constant 9.99999974E-6 : f32
    %16 = vector.broadcast %cst_6 : f32 to vector<1x1x16xf32>
    %17 = arith.addf %13, %16 : vector<1x1x16xf32>
    %18 = math.rsqrt %17 : vector<1x1x16xf32>
    %19 = vector.broadcast %18 : vector<1x1x16xf32> to vector<1x64x16xf32>
    %20 = arith.mulf %15, %19 : vector<1x64x16xf32>
    %cst_7 = arith.constant 0.000000e+00 : f32
    %21 = vector.broadcast %cst_7 : f32 to vector<1x64x16xf32>
    %22 = arith.cmpf ogt, %20, %21 : vector<1x64x16xf32>
    %cst_8 = arith.constant 2.000000e-01 : f32
    %23 = vector.broadcast %cst_8 : f32 to vector<1x64x16xf32>
    %24 = arith.mulf %23, %20 : vector<1x64x16xf32>
    %25 = arith.select %22, %20, %24 : vector<1x64x16xi1>, vector<1x64x16xf32>
    %c0_9 = arith.constant 0 : index
    %c0_10 = arith.constant 0 : index
    %c0_11 = arith.constant 0 : index
    %26 = vector.load %arg3[%c0_9, %c0_10, %c0_11] : memref<1x64x16xf32, #tpu.memory_space<vmem>>, vector<1x64x16xf32>
    tpu.vector_store %arg3[%c0_9, %c0_10, %c0_11], %25 {strides = array<i32>} : memref<1x64x16xf32, #tpu.memory_space<vmem>>, vector<1x64x16xf32>,
    return
  }
  func.func @transform_0(%arg0: i32, %arg1: i32) -> (i32, i32, i32) {
    %c0_i32 = arith.constant 0 : i32
    %c0_i32_0 = arith.constant 0 : i32
    return %arg0, %c0_i32, %arg1 : i32, i32, i32
  }
  func.func @transform_1(%arg0: i32, %arg1: i32) -> (i32, i32, i32) {
    %c0_i32 = arith.constant 0 : i32
    %c0_i32_0 = arith.constant 0 : i32
    return %arg0, %c0_i32, %arg1 : i32, i32, i32
  }
}

module attributes {stable_mosaic.version = 11 : i64} {
  func.func @_matmul_kernel(%arg0: i32, %arg1: i32, %arg2: i32, %arg3: memref<32x256xbf16, #tpu.memory_space<vmem>>, %arg4: memref<256x128xbf16, #tpu.memory_space<vmem>>, %arg5: memref<32x128xf32, #tpu.memory_space<vmem>>, %arg6: memref<32x128xf32, #tpu.memory_space<vmem>>) attributes {dimension_semantics = [#tpu.dimension_semantics<parallel>, #tpu.dimension_semantics<parallel>, #tpu.dimension_semantics<arbitrary>], iteration_bounds = array<i64: 1, 1, 1>, scalar_prefetch = 0 : i64, scratch_operands = 1 : i64, tpu.core_type = #tpu.core_type<tc>, window_params = [{transform_indices = @transform_0, window_bounds = array<i64: 32, 256>}, {transform_indices = @transform_1, window_bounds = array<i64: 256, 128>}, {transform_indices = @transform_2, window_bounds = array<i64: 32, 128>}]} {
    %c0_i32 = arith.constant 0 : i32
    %0 = arith.cmpi eq, %arg2, %c0_i32 : i32
    %1 = arith.extui %0 : i1 to i32
    %c0_i32_0 = arith.constant 0 : i32
    %2 = arith.cmpi ne, %1, %c0_i32_0 : i32
    scf.if %2 {
      %cst_10 = arith.constant 0.000000e+00 : f32
      %12 = vector.broadcast %cst_10 : f32 to vector<32x128xf32>
      %c0_11 = arith.constant 0 : index
      %c0_12 = arith.constant 0 : index
      %13 = vector.load %arg6[%c0_11, %c0_12] : memref<32x128xf32, #tpu.memory_space<vmem>>, vector<32x128xf32>
      tpu.vector_store %arg6[%c0_11, %c0_12], %12 {strides = array<i32>} : memref<32x128xf32, #tpu.memory_space<vmem>>, vector<32x128xf32>,
    } else {
    }
    %c0 = arith.constant 0 : index
    %c0_1 = arith.constant 0 : index
    %3 = vector.load %arg6[%c0, %c0_1] : memref<32x128xf32, #tpu.memory_space<vmem>>, vector<32x128xf32>
    %c0_2 = arith.constant 0 : index
    %c0_3 = arith.constant 0 : index
    %4 = vector.load %arg3[%c0_2, %c0_3] : memref<32x256xbf16, #tpu.memory_space<vmem>>, vector<32x256xbf16>
    %c0_4 = arith.constant 0 : index
    %c0_5 = arith.constant 0 : index
    %5 = vector.load %arg4[%c0_4, %c0_5] : memref<256x128xbf16, #tpu.memory_space<vmem>>, vector<256x128xbf16>
    %cst = arith.constant dense<0.000000e+00> : vector<32x128xf32>
    %6 = tpu.matmul %4, %5, %cst {dimension_numbers = #tpu.dot_dimension_numbers<[1], [0], [0], [1], [0, 0, 1, 1], [], []>} : vector<32x256xbf16>, vector<256x128xbf16>, vector<32x128xf32> -> vector<32x128xf32>
    %7 = arith.addf %3, %6 : vector<32x128xf32>
    %c0_6 = arith.constant 0 : index
    %c0_7 = arith.constant 0 : index
    %8 = vector.load %arg6[%c0_6, %c0_7] : memref<32x128xf32, #tpu.memory_space<vmem>>, vector<32x128xf32>
    tpu.vector_store %arg6[%c0_6, %c0_7], %7 {strides = array<i32>} : memref<32x128xf32, #tpu.memory_space<vmem>>, vector<32x128xf32>,
    %c0_i32_8 = arith.constant 0 : i32
    %9 = arith.cmpi eq, %arg2, %c0_i32_8 : i32
    %10 = arith.extui %9 : i1 to i32
    %c0_i32_9 = arith.constant 0 : i32
    %11 = arith.cmpi ne, %10, %c0_i32_9 : i32
    scf.if %11 {
      %c0_10 = arith.constant 0 : index
      %c0_11 = arith.constant 0 : index
      %12 = vector.load %arg6[%c0_10, %c0_11] : memref<32x128xf32, #tpu.memory_space<vmem>>, vector<32x128xf32>
      %c0_12 = arith.constant 0 : index
      %c0_13 = arith.constant 0 : index
      %13 = vector.load %arg5[%c0_12, %c0_13] : memref<32x128xf32, #tpu.memory_space<vmem>>, vector<32x128xf32>
      tpu.vector_store %arg5[%c0_12, %c0_13], %12 {strides = array<i32>} : memref<32x128xf32, #tpu.memory_space<vmem>>, vector<32x128xf32>,
    } else {
    }
    return
  }
  func.func @transform_0(%arg0: i32, %arg1: i32, %arg2: i32) -> (i32, i32) {
    %c0_i32 = arith.constant 0 : i32
    return %arg0, %arg2 : i32, i32
  }
  func.func @transform_1(%arg0: i32, %arg1: i32, %arg2: i32) -> (i32, i32) {
    %c0_i32 = arith.constant 0 : i32
    return %arg2, %arg1 : i32, i32
  }
  func.func @transform_2(%arg0: i32, %arg1: i32, %arg2: i32) -> (i32, i32) {
    %c0_i32 = arith.constant 0 : i32
    return %arg0, %arg1 : i32, i32
  }
}

module attributes {stable_mosaic.version = 11 : i64} {
  func.func @_instnorm_leaky_kernel(%arg0: i32, %arg1: i32, %arg2: memref<1x16x32xf32, #tpu.memory_space<vmem>>, %arg3: memref<1x16x32xf32, #tpu.memory_space<vmem>>) attributes {dimension_semantics = [#tpu.dimension_semantics<parallel>, #tpu.dimension_semantics<parallel>], iteration_bounds = array<i64: 2, 1>, scalar_prefetch = 0 : i64, scratch_operands = 0 : i64, tpu.core_type = #tpu.core_type<tc>, window_params = [{transform_indices = @transform_0, window_bounds = array<i64: 1, 16, 32>}, {transform_indices = @transform_1, window_bounds = array<i64: 1, 16, 32>}]} {
    %c0 = arith.constant 0 : index
    %c0_0 = arith.constant 0 : index
    %c0_1 = arith.constant 0 : index
    %0 = vector.load %arg2[%c0, %c0_0, %c0_1] : memref<1x16x32xf32, #tpu.memory_space<vmem>>, vector<1x16x32xf32>
    %cst = arith.constant dense<0.000000e+00> : vector<1x32xf32>
    %1 = vector.multi_reduction <add>, %0, %cst [1] : vector<1x16x32xf32> to vector<1x32xf32>
    %2 = vector.shape_cast %1 : vector<1x32xf32> to vector<1x1x32xf32>
    %cst_2 = arith.constant 1.600000e+01 : f32
    %3 = vector.broadcast %cst_2 : f32 to vector<1x1x32xf32>
    %4 = arith.divf %2, %3 : vector<1x1x32xf32>
    %5 = arith.mulf %0, %0 : vector<1x16x32xf32>
    %cst_3 = arith.constant dense<0.000000e+00> : vector<1x32xf32>
    %6 = vector.multi_reduction <add>, %5, %cst_3 [1] : vector<1x16x32xf32> to vector<1x32xf32>
    %7 = vector.shape_cast %6 : vector<1x32xf32> to vector<1x1x32xf32>
    %cst_4 = arith.constant 1.600000e+01 : f32
    %8 = vector.broadcast %cst_4 : f32 to vector<1x1x32xf32>
    %9 = arith.divf %7, %8 : vector<1x1x32xf32>
    %10 = arith.mulf %4, %4 : vector<1x1x32xf32>
    %11 = arith.subf %9, %10 : vector<1x1x32xf32>
    %cst_5 = arith.constant 0.000000e+00 : f32
    %12 = vector.broadcast %cst_5 : f32 to vector<1x1x32xf32>
    %13 = arith.maximumf %11, %12 : vector<1x1x32xf32>
    %14 = vector.broadcast %4 : vector<1x1x32xf32> to vector<1x16x32xf32>
    %15 = arith.subf %0, %14 : vector<1x16x32xf32>
    %cst_6 = arith.constant 9.99999974E-6 : f32
    %16 = vector.broadcast %cst_6 : f32 to vector<1x1x32xf32>
    %17 = arith.addf %13, %16 : vector<1x1x32xf32>
    %18 = math.rsqrt %17 : vector<1x1x32xf32>
    %19 = vector.broadcast %18 : vector<1x1x32xf32> to vector<1x16x32xf32>
    %20 = arith.mulf %15, %19 : vector<1x16x32xf32>
    %cst_7 = arith.constant 0.000000e+00 : f32
    %21 = vector.broadcast %cst_7 : f32 to vector<1x16x32xf32>
    %22 = arith.cmpf ogt, %20, %21 : vector<1x16x32xf32>
    %cst_8 = arith.constant 2.000000e-01 : f32
    %23 = vector.broadcast %cst_8 : f32 to vector<1x16x32xf32>
    %24 = arith.mulf %23, %20 : vector<1x16x32xf32>
    %25 = arith.select %22, %20, %24 : vector<1x16x32xi1>, vector<1x16x32xf32>
    %c0_9 = arith.constant 0 : index
    %c0_10 = arith.constant 0 : index
    %c0_11 = arith.constant 0 : index
    %26 = vector.load %arg3[%c0_9, %c0_10, %c0_11] : memref<1x16x32xf32, #tpu.memory_space<vmem>>, vector<1x16x32xf32>
    tpu.vector_store %arg3[%c0_9, %c0_10, %c0_11], %25 {strides = array<i32>} : memref<1x16x32xf32, #tpu.memory_space<vmem>>, vector<1x16x32xf32>,
    return
  }
  func.func @transform_0(%arg0: i32, %arg1: i32) -> (i32, i32, i32) {
    %c0_i32 = arith.constant 0 : i32
    %c0_i32_0 = arith.constant 0 : i32
    return %arg0, %c0_i32, %arg1 : i32, i32, i32
  }
  func.func @transform_1(%arg0: i32, %arg1: i32) -> (i32, i32, i32) {
    %c0_i32 = arith.constant 0 : i32
    %c0_i32_0 = arith.constant 0 : i32
    return %arg0, %c0_i32, %arg1 : i32, i32, i32
  }
}

module attributes {stable_mosaic.version = 11 : i64} {
  func.func @_matmul_kernel(%arg0: i32, %arg1: i32, %arg2: i32, %arg3: memref<24x512xbf16, #tpu.memory_space<vmem>>, %arg4: memref<512x128xbf16, #tpu.memory_space<vmem>>, %arg5: memref<24x128xf32, #tpu.memory_space<vmem>>, %arg6: memref<24x128xf32, #tpu.memory_space<vmem>>) attributes {dimension_semantics = [#tpu.dimension_semantics<parallel>, #tpu.dimension_semantics<parallel>, #tpu.dimension_semantics<arbitrary>], iteration_bounds = array<i64: 1, 1, 1>, scalar_prefetch = 0 : i64, scratch_operands = 1 : i64, tpu.core_type = #tpu.core_type<tc>, window_params = [{transform_indices = @transform_0, window_bounds = array<i64: 24, 512>}, {transform_indices = @transform_1, window_bounds = array<i64: 512, 128>}, {transform_indices = @transform_2, window_bounds = array<i64: 24, 128>}]} {
    %c0_i32 = arith.constant 0 : i32
    %0 = arith.cmpi eq, %arg2, %c0_i32 : i32
    %1 = arith.extui %0 : i1 to i32
    %c0_i32_0 = arith.constant 0 : i32
    %2 = arith.cmpi ne, %1, %c0_i32_0 : i32
    scf.if %2 {
      %cst_10 = arith.constant 0.000000e+00 : f32
      %12 = vector.broadcast %cst_10 : f32 to vector<24x128xf32>
      %c0_11 = arith.constant 0 : index
      %c0_12 = arith.constant 0 : index
      %13 = vector.load %arg6[%c0_11, %c0_12] : memref<24x128xf32, #tpu.memory_space<vmem>>, vector<24x128xf32>
      tpu.vector_store %arg6[%c0_11, %c0_12], %12 {strides = array<i32>} : memref<24x128xf32, #tpu.memory_space<vmem>>, vector<24x128xf32>,
    } else {
    }
    %c0 = arith.constant 0 : index
    %c0_1 = arith.constant 0 : index
    %3 = vector.load %arg6[%c0, %c0_1] : memref<24x128xf32, #tpu.memory_space<vmem>>, vector<24x128xf32>
    %c0_2 = arith.constant 0 : index
    %c0_3 = arith.constant 0 : index
    %4 = vector.load %arg3[%c0_2, %c0_3] : memref<24x512xbf16, #tpu.memory_space<vmem>>, vector<24x512xbf16>
    %c0_4 = arith.constant 0 : index
    %c0_5 = arith.constant 0 : index
    %5 = vector.load %arg4[%c0_4, %c0_5] : memref<512x128xbf16, #tpu.memory_space<vmem>>, vector<512x128xbf16>
    %cst = arith.constant dense<0.000000e+00> : vector<24x128xf32>
    %6 = tpu.matmul %4, %5, %cst {dimension_numbers = #tpu.dot_dimension_numbers<[1], [0], [0], [1], [0, 0, 1, 1], [], []>} : vector<24x512xbf16>, vector<512x128xbf16>, vector<24x128xf32> -> vector<24x128xf32>
    %7 = arith.addf %3, %6 : vector<24x128xf32>
    %c0_6 = arith.constant 0 : index
    %c0_7 = arith.constant 0 : index
    %8 = vector.load %arg6[%c0_6, %c0_7] : memref<24x128xf32, #tpu.memory_space<vmem>>, vector<24x128xf32>
    tpu.vector_store %arg6[%c0_6, %c0_7], %7 {strides = array<i32>} : memref<24x128xf32, #tpu.memory_space<vmem>>, vector<24x128xf32>,
    %c0_i32_8 = arith.constant 0 : i32
    %9 = arith.cmpi eq, %arg2, %c0_i32_8 : i32
    %10 = arith.extui %9 : i1 to i32
    %c0_i32_9 = arith.constant 0 : i32
    %11 = arith.cmpi ne, %10, %c0_i32_9 : i32
    scf.if %11 {
      %c0_10 = arith.constant 0 : index
      %c0_11 = arith.constant 0 : index
      %12 = vector.load %arg6[%c0_10, %c0_11] : memref<24x128xf32, #tpu.memory_space<vmem>>, vector<24x128xf32>
      %c0_12 = arith.constant 0 : index
      %c0_13 = arith.constant 0 : index
      %13 = vector.load %arg5[%c0_12, %c0_13] : memref<24x128xf32, #tpu.memory_space<vmem>>, vector<24x128xf32>
      tpu.vector_store %arg5[%c0_12, %c0_13], %12 {strides = array<i32>} : memref<24x128xf32, #tpu.memory_space<vmem>>, vector<24x128xf32>,
    } else {
    }
    return
  }
  func.func @transform_0(%arg0: i32, %arg1: i32, %arg2: i32) -> (i32, i32) {
    %c0_i32 = arith.constant 0 : i32
    return %arg0, %arg2 : i32, i32
  }
  func.func @transform_1(%arg0: i32, %arg1: i32, %arg2: i32) -> (i32, i32) {
    %c0_i32 = arith.constant 0 : i32
    return %arg2, %arg1 : i32, i32
  }
  func.func @transform_2(%arg0: i32, %arg1: i32, %arg2: i32) -> (i32, i32) {
    %c0_i32 = arith.constant 0 : i32
    return %arg0, %arg1 : i32, i32
  }
}

module attributes {stable_mosaic.version = 11 : i64} {
  func.func @_instnorm_leaky_kernel(%arg0: i32, %arg1: i32, %arg2: memref<1x9x64xf32, #tpu.memory_space<vmem>>, %arg3: memref<1x9x64xf32, #tpu.memory_space<vmem>>) attributes {dimension_semantics = [#tpu.dimension_semantics<parallel>, #tpu.dimension_semantics<parallel>], iteration_bounds = array<i64: 2, 1>, scalar_prefetch = 0 : i64, scratch_operands = 0 : i64, tpu.core_type = #tpu.core_type<tc>, window_params = [{transform_indices = @transform_0, window_bounds = array<i64: 1, 9, 64>}, {transform_indices = @transform_1, window_bounds = array<i64: 1, 9, 64>}]} {
    %c0 = arith.constant 0 : index
    %c0_0 = arith.constant 0 : index
    %c0_1 = arith.constant 0 : index
    %0 = vector.load %arg2[%c0, %c0_0, %c0_1] : memref<1x9x64xf32, #tpu.memory_space<vmem>>, vector<1x9x64xf32>
    %cst = arith.constant dense<0.000000e+00> : vector<1x64xf32>
    %1 = vector.multi_reduction <add>, %0, %cst [1] : vector<1x9x64xf32> to vector<1x64xf32>
    %2 = vector.shape_cast %1 : vector<1x64xf32> to vector<1x1x64xf32>
    %cst_2 = arith.constant 9.000000e+00 : f32
    %3 = vector.broadcast %cst_2 : f32 to vector<1x1x64xf32>
    %4 = arith.divf %2, %3 : vector<1x1x64xf32>
    %5 = arith.mulf %0, %0 : vector<1x9x64xf32>
    %cst_3 = arith.constant dense<0.000000e+00> : vector<1x64xf32>
    %6 = vector.multi_reduction <add>, %5, %cst_3 [1] : vector<1x9x64xf32> to vector<1x64xf32>
    %7 = vector.shape_cast %6 : vector<1x64xf32> to vector<1x1x64xf32>
    %cst_4 = arith.constant 9.000000e+00 : f32
    %8 = vector.broadcast %cst_4 : f32 to vector<1x1x64xf32>
    %9 = arith.divf %7, %8 : vector<1x1x64xf32>
    %10 = arith.mulf %4, %4 : vector<1x1x64xf32>
    %11 = arith.subf %9, %10 : vector<1x1x64xf32>
    %cst_5 = arith.constant 0.000000e+00 : f32
    %12 = vector.broadcast %cst_5 : f32 to vector<1x1x64xf32>
    %13 = arith.maximumf %11, %12 : vector<1x1x64xf32>
    %14 = vector.broadcast %4 : vector<1x1x64xf32> to vector<1x9x64xf32>
    %15 = arith.subf %0, %14 : vector<1x9x64xf32>
    %cst_6 = arith.constant 9.99999974E-6 : f32
    %16 = vector.broadcast %cst_6 : f32 to vector<1x1x64xf32>
    %17 = arith.addf %13, %16 : vector<1x1x64xf32>
    %18 = math.rsqrt %17 : vector<1x1x64xf32>
    %19 = vector.broadcast %18 : vector<1x1x64xf32> to vector<1x9x64xf32>
    %20 = arith.mulf %15, %19 : vector<1x9x64xf32>
    %cst_7 = arith.constant 0.000000e+00 : f32
    %21 = vector.broadcast %cst_7 : f32 to vector<1x9x64xf32>
    %22 = arith.cmpf ogt, %20, %21 : vector<1x9x64xf32>
    %cst_8 = arith.constant 2.000000e-01 : f32
    %23 = vector.broadcast %cst_8 : f32 to vector<1x9x64xf32>
    %24 = arith.mulf %23, %20 : vector<1x9x64xf32>
    %25 = arith.select %22, %20, %24 : vector<1x9x64xi1>, vector<1x9x64xf32>
    %c0_9 = arith.constant 0 : index
    %c0_10 = arith.constant 0 : index
    %c0_11 = arith.constant 0 : index
    %26 = vector.load %arg3[%c0_9, %c0_10, %c0_11] : memref<1x9x64xf32, #tpu.memory_space<vmem>>, vector<1x9x64xf32>
    tpu.vector_store %arg3[%c0_9, %c0_10, %c0_11], %25 {strides = array<i32>} : memref<1x9x64xf32, #tpu.memory_space<vmem>>, vector<1x9x64xf32>,
    return
  }
  func.func @transform_0(%arg0: i32, %arg1: i32) -> (i32, i32, i32) {
    %c0_i32 = arith.constant 0 : i32
    %c0_i32_0 = arith.constant 0 : i32
    return %arg0, %c0_i32, %arg1 : i32, i32, i32
  }
  func.func @transform_1(%arg0: i32, %arg1: i32) -> (i32, i32, i32) {
    %c0_i32 = arith.constant 0 : i32
    %c0_i32_0 = arith.constant 0 : i32
    return %arg0, %c0_i32, %arg1 : i32, i32, i32
  }
}

module attributes {stable_mosaic.version = 11 : i64} {
  func.func @_matmul_bias_kernel(%arg0: i32, %arg1: i32, %arg2: i32, %arg3: memref<8x512xbf16, #tpu.memory_space<vmem>>, %arg4: memref<512x128xbf16, #tpu.memory_space<vmem>>, %arg5: memref<1x128xf32, #tpu.memory_space<vmem>>, %arg6: memref<8x128xf32, #tpu.memory_space<vmem>>, %arg7: memref<8x128xf32, #tpu.memory_space<vmem>>) attributes {dimension_semantics = [#tpu.dimension_semantics<parallel>, #tpu.dimension_semantics<parallel>, #tpu.dimension_semantics<arbitrary>], iteration_bounds = array<i64: 1, 1, 2>, scalar_prefetch = 0 : i64, scratch_operands = 1 : i64, tpu.core_type = #tpu.core_type<tc>, window_params = [{transform_indices = @transform_0, window_bounds = array<i64: 8, 512>}, {transform_indices = @transform_1, window_bounds = array<i64: 512, 128>}, {transform_indices = @transform_2, window_bounds = array<i64: 1, 128>}, {transform_indices = @transform_3, window_bounds = array<i64: 8, 128>}]} {
    %c0_i32 = arith.constant 0 : i32
    %0 = arith.cmpi eq, %arg2, %c0_i32 : i32
    %1 = arith.extui %0 : i1 to i32
    %c0_i32_0 = arith.constant 0 : i32
    %2 = arith.cmpi ne, %1, %c0_i32_0 : i32
    scf.if %2 {
      %cst_9 = arith.constant 0.000000e+00 : f32
      %12 = vector.broadcast %cst_9 : f32 to vector<8x128xf32>
      %c0_10 = arith.constant 0 : index
      %c0_11 = arith.constant 0 : index
      %13 = vector.load %arg7[%c0_10, %c0_11] : memref<8x128xf32, #tpu.memory_space<vmem>>, vector<8x128xf32>
      tpu.vector_store %arg7[%c0_10, %c0_11], %12 {strides = array<i32>} : memref<8x128xf32, #tpu.memory_space<vmem>>, vector<8x128xf32>,
    } else {
    }
    %c0 = arith.constant 0 : index
    %c0_1 = arith.constant 0 : index
    %3 = vector.load %arg7[%c0, %c0_1] : memref<8x128xf32, #tpu.memory_space<vmem>>, vector<8x128xf32>
    %c0_2 = arith.constant 0 : index
    %c0_3 = arith.constant 0 : index
    %4 = vector.load %arg3[%c0_2, %c0_3] : memref<8x512xbf16, #tpu.memory_space<vmem>>, vector<8x512xbf16>
    %c0_4 = arith.constant 0 : index
    %c0_5 = arith.constant 0 : index
    %5 = vector.load %arg4[%c0_4, %c0_5] : memref<512x128xbf16, #tpu.memory_space<vmem>>, vector<512x128xbf16>
    %cst = arith.constant dense<0.000000e+00> : vector<8x128xf32>
    %6 = tpu.matmul %4, %5, %cst {dimension_numbers = #tpu.dot_dimension_numbers<[1], [0], [0], [1], [0, 0, 1, 1], [], []>} : vector<8x512xbf16>, vector<512x128xbf16>, vector<8x128xf32> -> vector<8x128xf32>
    %7 = arith.addf %3, %6 : vector<8x128xf32>
    %c0_6 = arith.constant 0 : index
    %c0_7 = arith.constant 0 : index
    %8 = vector.load %arg7[%c0_6, %c0_7] : memref<8x128xf32, #tpu.memory_space<vmem>>, vector<8x128xf32>
    tpu.vector_store %arg7[%c0_6, %c0_7], %7 {strides = array<i32>} : memref<8x128xf32, #tpu.memory_space<vmem>>, vector<8x128xf32>,
    %c1_i32 = arith.constant 1 : i32
    %9 = arith.cmpi eq, %arg2, %c1_i32 : i32
    %10 = arith.extui %9 : i1 to i32
    %c0_i32_8 = arith.constant 0 : i32
    %11 = arith.cmpi ne, %10, %c0_i32_8 : i32
    scf.if %11 {
      %c0_9 = arith.constant 0 : index
      %c0_10 = arith.constant 0 : index
      %12 = vector.load %arg7[%c0_9, %c0_10] : memref<8x128xf32, #tpu.memory_space<vmem>>, vector<8x128xf32>
      %c0_11 = arith.constant 0 : index
      %c0_12 = arith.constant 0 : index
      %13 = vector.load %arg5[%c0_11, %c0_12] : memref<1x128xf32, #tpu.memory_space<vmem>>, vector<1x128xf32>
      %14 = vector.broadcast %13 : vector<1x128xf32> to vector<8x128xf32>
      %15 = arith.addf %12, %14 : vector<8x128xf32>
      %c0_13 = arith.constant 0 : index
      %c0_14 = arith.constant 0 : index
      %16 = vector.load %arg6[%c0_13, %c0_14] : memref<8x128xf32, #tpu.memory_space<vmem>>, vector<8x128xf32>
      tpu.vector_store %arg6[%c0_13, %c0_14], %15 {strides = array<i32>} : memref<8x128xf32, #tpu.memory_space<vmem>>, vector<8x128xf32>,
    } else {
    }
    return
  }
  func.func @transform_0(%arg0: i32, %arg1: i32, %arg2: i32) -> (i32, i32) {
    %c0_i32 = arith.constant 0 : i32
    return %arg0, %arg2 : i32, i32
  }
  func.func @transform_1(%arg0: i32, %arg1: i32, %arg2: i32) -> (i32, i32) {
    %c0_i32 = arith.constant 0 : i32
    return %arg2, %arg1 : i32, i32
  }
  func.func @transform_2(%arg0: i32, %arg1: i32, %arg2: i32) -> (i32, i32) {
    %c0_i32 = arith.constant 0 : i32
    %c0_i32_0 = arith.constant 0 : i32
    return %c0_i32, %arg1 : i32, i32
  }
  func.func @transform_3(%arg0: i32, %arg1: i32, %arg2: i32) -> (i32, i32) {
    %c0_i32 = arith.constant 0 : i32
    return %arg0, %arg1 : i32, i32
  }
}

</mosaic_0001>

<bundles_post_ra>
// kernel: _forward.8
= control target key start
LH: loop header
LB: loop body
LE: loop exit
PB: predicated region body
PF: predicated region fallthrough
CT: control target
= control target key end

     0   :  { %s1751_s1 = inlined_call_operand.vmem [shape: bf16[128,128], index: 1, kind: input, shape index: {}]   ;;  %s1752_s0 = inlined_call_operand.vmem [shape: bf16[512,128], index: 0, kind: input, shape index: {}]   ;;  %s1753_s2 = inlined_call_operand.vmem [shape: f32[512,128], index: 2, kind: output, shape index: {}]  }
   0x1   :  { %v1384_v0 = vld [vmem:[%s1751_s1 + $0x38] sm:$0xff]   ;;  %v1385_v1 = vld [vmem:[%s1751_s1 + $0x30] sm:$0xff]   ;;  %v1386_v2 = vld [vmem:[%s1751_s1 + $0x28] sm:$0xff]  }
   0x2   :  { %1288 = vmatprep.subr.bf16.mxu0 %v1384_v0  ;;  %1368 = vmatprep.subr.bf16.mxu1 %v1384_v0  ;;  %v1387_v3 = vld [vmem:[%s1751_s1 + $0x20] sm:$0xff]   ;;  %v1388_v6 = vld [vmem:[%s1751_s1 + $0x18] sm:$0xff]   ;;  %v1389_v7 = vld [vmem:[%s1751_s1 + $0x10] sm:$0xff]  }
   0x3   :  { %1289 = vmatpush3.bf16.msra.mxu0 %v1384_v0  ;;  %1376 = vmatpush3.bf16.msra.mxu1 %v1384_v0  ;;  %v1392_v4 = vld [vmem:[%s1752_s0] sm:$0xff]   ;;  %v1390_v8 = vld [vmem:[%s1751_s1 + $0x8] sm:$0xff]   ;;  %v1396_v12 = vld [vmem:[%s1752_s0 + $0x10] sm:$0xff]  }
   0x4   :  { %1290 = vmatprep.subr.bf16.mxu0 %v1385_v1  ;;  %1369 = vmatprep.subr.bf16.mxu1 %v1385_v1  ;;  %v1393_v5 = vld [vmem:[%s1752_s0 + $0x80] sm:$0xff]   ;;  %v1394_v10 = vld [vmem:[%s1752_s0 + $0x8] sm:$0xff]   ;;  %v1397_v13 = vld [vmem:[%s1752_s0 + $0x90] sm:$0xff]  }
   0x5   :  { %1304 = vmatprep.mubr.bf16.mxu0 %v1392_v4  ;;  %1336 = vmatprep.mubr.bf16.mxu1 %v1393_v5  ;;  %v1391_v9 = vld [vmem:[%s1751_s1] sm:$0xff]   ;;  %v1395_v11 = vld [vmem:[%s1752_s0 + $0x88] sm:$0xff]   ;;  %v1398_v14 = vld [vmem:[%s1752_s0 + $0x18] sm:$0xff]  }
   0x6   :  { %v1399_v15 = vld [vmem:[%s1752_s0 + $0x98] sm:$0xff]   ;;  %v1400_v16 = vld [vmem:[%s1752_s0 + $0x20] sm:$0xff]   ;;  %v1402_v18 = vld [vmem:[%s1752_s0 + $0x28] sm:$0xff]  }
   0x7   :  { %1291 = vmatpush3.bf16.msra.mxu0 %v1385_v1  ;;  %1377 = vmatpush3.bf16.msra.mxu1 %v1385_v1  ;;  %v1401_v17 = vld [vmem:[%s1752_s0 + $0xa0] sm:$0xff]   ;;  %v1403_v19 = vld [vmem:[%s1752_s0 + $0xa8] sm:$0xff]   ;;  %v1404_v20 = vld [vmem:[%s1752_s0 + $0x30] sm:$0xff]  }
   0x8   :  { %1292 = vmatprep.subr.bf16.mxu0 %v1386_v2  ;;  %1370 = vmatprep.subr.bf16.mxu1 %v1386_v2  ;;  %v1405_v21 = vld [vmem:[%s1752_s0 + $0xb0] sm:$0xff]   ;;  %v1406_v22 = vld [vmem:[%s1752_s0 + $0x38] sm:$0xff]   ;;  %v1408_v24 = vld [vmem:[%s1752_s0 + $0x40] sm:$0xff]  }
   0x9   :  { %v1407_v23 = vld [vmem:[%s1752_s0 + $0xb8] sm:$0xff]   ;;  %v1409_v25 = vld [vmem:[%s1752_s0 + $0xc0] sm:$0xff]   ;;  %v1410_v26 = vld [vmem:[%s1752_s0 + $0x48] sm:$0xff]  }
   0xa   :  { %v1411_v27 = vld [vmem:[%s1752_s0 + $0xc8] sm:$0xff]   ;;  %v1412_v28 = vld [vmem:[%s1752_s0 + $0x50] sm:$0xff]   ;;  %v1414_v30 = vld [vmem:[%s1752_s0 + $0x58] sm:$0xff]  }
   0xb   :  { %1293 = vmatpush3.bf16.msra.mxu0 %v1386_v2  ;;  %1378 = vmatpush3.bf16.msra.mxu1 %v1386_v2  ;;  %v1413_v29 = vld [vmem:[%s1752_s0 + $0xd0] sm:$0xff]   ;;  %v1415_v31 = vld [vmem:[%s1752_s0 + $0xd8] sm:$0xff]   ;;  %v1416_v32 = vld [vmem:[%s1752_s0 + $0x60] sm:$0xff]  }
   0xc   :  { %1294 = vmatprep.subr.bf16.mxu0 %v1387_v3  ;;  %1371 = vmatprep.subr.bf16.mxu1 %v1387_v3  ;;  %v1417_v33 = vld [vmem:[%s1752_s0 + $0xe0] sm:$0xff]   ;;  %v1418_v34 = vld [vmem:[%s1752_s0 + $0x68] sm:$0xff]   ;;  %v1420_v36 = vld [vmem:[%s1752_s0 + $0x70] sm:$0xff]  }
   0xd   :  { %v1419_v35 = vld [vmem:[%s1752_s0 + $0xe8] sm:$0xff]   ;;  %v1421_v37 = vld [vmem:[%s1752_s0 + $0xf0] sm:$0xff]   ;;  %v1422_v38 = vld [vmem:[%s1752_s0 + $0x78] sm:$0xff]  }
   0xe   :  { %v1423_v39 = vld [vmem:[%s1752_s0 + $0xf8] sm:$0xff]  }
   0xf   :  { %1295 = vmatpush3.bf16.msra.mxu0 %v1387_v3  ;;  %1379 = vmatpush3.bf16.msra.mxu1 %v1387_v3 }
  0x10   :  { %1296 = vmatprep.subr.bf16.mxu0 %v1388_v6  ;;  %1372 = vmatprep.subr.bf16.mxu1 %v1388_v6 }
  0x13   :  { %1297 = vmatpush3.bf16.msra.mxu0 %v1388_v6  ;;  %1380 = vmatpush3.bf16.msra.mxu1 %v1388_v6 }
  0x14   :  { %1298 = vmatprep.subr.bf16.mxu0 %v1389_v7  ;;  %1373 = vmatprep.subr.bf16.mxu1 %v1389_v7 }
  0x17   :  { %1299 = vmatpush3.bf16.msra.mxu0 %v1389_v7  ;;  %1381 = vmatpush3.bf16.msra.mxu1 %v1389_v7 }
  0x18   :  { %1300 = vmatprep.subr.bf16.mxu0 %v1390_v8  ;;  %1374 = vmatprep.subr.bf16.mxu1 %v1390_v8 }
  0x1b   :  { %1301 = vmatpush3.bf16.msra.mxu0 %v1390_v8  ;;  %1382 = vmatpush3.bf16.msra.mxu1 %v1390_v8 }
  0x1c   :  { %1302 = vmatprep.subr.bf16.mxu0 %v1391_v9  ;;  %1375 = vmatprep.subr.bf16.mxu1 %v1391_v9 }
  0x1f   :  { %1303 = vmatpush3.bf16.msra.mxu0 %v1391_v9  ;;  %1383 = vmatpush3.bf16.msra.mxu1 %v1391_v9 }
  0x22   :  { %1305 = vmatmul.mubr.bf16.vlgmr.msra.gmra.mxu0 %v1394_v10  ;;  %1337 = vmatmul.mubr.bf16.vlgmr.msra.gmra.mxu1 %v1395_v11 }
  0x23   :  { %1308 = vmatprep.mubr.bf16.mxu0 %v1396_v12  ;;  %1340 = vmatprep.mubr.bf16.mxu1 %v1397_v13 }
  0x2a   :  { %1309 = vmatmul.mubr.bf16.gmra.mxu0 %v1398_v14  ;;  %1341 = vmatmul.mubr.bf16.gmra.mxu1 %v1399_v15 }
  0x2b   :  { %1312 = vmatprep.mubr.bf16.mxu0 %v1400_v16  ;;  %1344 = vmatprep.mubr.bf16.mxu1 %v1401_v17 }
  0x32   :  { %1313 = vmatmul.mubr.bf16.gmra.mxu0 %v1402_v18  ;;  %1345 = vmatmul.mubr.bf16.gmra.mxu1 %v1403_v19 }
  0x33   :  { %1316 = vmatprep.mubr.bf16.mxu0 %v1404_v20  ;;  %1348 = vmatprep.mubr.bf16.mxu1 %v1405_v21 }
  0x3a   :  { %1317 = vmatmul.mubr.bf16.gmra.mxu0 %v1406_v22  ;;  %1349 = vmatmul.mubr.bf16.gmra.mxu1 %v1407_v23 }
  0x3b   :  { %1320 = vmatprep.mubr.bf16.mxu0 %v1408_v24  ;;  %1352 = vmatprep.mubr.bf16.mxu1 %v1409_v25 }
  0x42   :  { %1321 = vmatmul.mubr.bf16.gmra.mxu0 %v1410_v26  ;;  %1353 = vmatmul.mubr.bf16.gmra.mxu1 %v1411_v27 }
  0x43   :  { %1324 = vmatprep.mubr.bf16.mxu0 %v1412_v28  ;;  %1356 = vmatprep.mubr.bf16.mxu1 %v1413_v29 }
  0x4a   :  { %1325 = vmatmul.mubr.bf16.gmra.mxu0 %v1414_v30  ;;  %1357 = vmatmul.mubr.bf16.gmra.mxu1 %v1415_v31 }
  0x4b   :  { %1328 = vmatprep.mubr.bf16.mxu0 %v1416_v32  ;;  %1360 = vmatprep.mubr.bf16.mxu1 %v1417_v33 }
  0x52   :  { %1329 = vmatmul.mubr.bf16.gmra.mxu0 %v1418_v34  ;;  %1361 = vmatmul.mubr.bf16.gmra.mxu1 %v1419_v35 }
  0x53   :  { %1332 = vmatprep.mubr.bf16.mxu0 %v1420_v36  ;;  %1364 = vmatprep.mubr.bf16.mxu1 %v1421_v37 }
  0x5a   :  { %1333 = vmatmul.mubr.bf16.gmra.mxu0 %v1422_v38  ;;  %1365 = vmatmul.mubr.bf16.gmra.mxu1 %v1423_v39 }
  0xe2   :  { %v1306_v40 = vpop.f32.mrf.mxu0  ;;  %v1338_v41 = vpop.f32.mrf.mxu1 }
  0xe3   :  { %vm950_vm0 = vcmp.gt.f32.partialorder %v1306_v40, 0.0  ;;  %v1014_v42 = vmul.f32 0.2, %v1306_v40  ;;  %vm982_vm1 = vcmp.gt.f32.partialorder %v1338_v41, 0.0  ;;  %v1046_v43 = vmul.f32 0.2, %v1338_v41 }
  0xe4   :  { %v498_v44 = vpop.f32.mrf.mxu0  ;;  %v626_v45 = vpop.f32.mrf.mxu1 }
  0xe5   :  { %v1078_v46 = vsel %vm950_vm0, %v1306_v40, %v1014_v42  ;;  %v1110_v47 = vsel %vm982_vm1, %v1338_v41, %v1046_v43  ;;  %vm948_vm2 = vcmp.gt.f32.partialorder %v498_v44, 0.0  ;;  %v1012_v48 = vmul.f32 0.2, %v498_v44 }
  0xe6   :  { %1142 = vst [vmem:[%s1753_s2 + $0x10] sm:$0xff] %v1078_v46  ;;  %1174 = vst [vmem:[%s1753_s2 + $0x110] sm:$0xff] %v1110_v47  ;;  %vm980_vm3 = vcmp.gt.f32.partialorder %v626_v45, 0.0  ;;  %v1044_v49 = vmul.f32 0.2, %v626_v45  ;;  %v1307_v50 = vpop.f32.mrf.mxu0  ;;  %v1339_v51 = vpop.f32.mrf.mxu1 }
  0xe7   :  { %v1076_v52 = vsel %vm948_vm2, %v498_v44, %v1012_v48  ;;  %vm951_vm4 = vcmp.gt.f32.partialorder %v1307_v50, 0.0  ;;  %v1015_v53 = vmul.f32 0.2, %v1307_v50  ;;  %vm983_vm5 = vcmp.gt.f32.partialorder %v1339_v51, 0.0 }
  0xe8   :  { %1140 = vst [vmem:[%s1753_s2] sm:$0xff] %v1076_v52  ;;  %v1108_v54 = vsel %vm980_vm3, %v626_v45, %v1044_v49  ;;  %v1047_v55 = vmul.f32 0.2, %v1339_v51  ;;  %v501_v56 = vpop.f32.mrf.mxu0  ;;  %v629_v57 = vpop.f32.mrf.mxu1 }
  0xe9   :  { %1172 = vst [vmem:[%s1753_s2 + $0x100] sm:$0xff] %v1108_v54  ;;  %v1079_v58 = vsel %vm951_vm4, %v1307_v50, %v1015_v53  ;;  %vm949_vm6 = vcmp.gt.f32.partialorder %v501_v56, 0.0  ;;  %v1013_v59 = vmul.f32 0.2, %v501_v56  ;;  %vm981_vm7 = vcmp.gt.f32.partialorder %v629_v57, 0.0 }
  0xea   :  { %1143 = vst [vmem:[%s1753_s2 + $0x18] sm:$0xff] %v1079_v58  ;;  %v1111_v60 = vsel %vm983_vm5, %v1339_v51, %v1047_v55  ;;  %v1045_v61 = vmul.f32 0.2, %v629_v57  ;;  %v1310_v62 = vpop.f32.mrf.mxu0  ;;  %v1342_v63 = vpop.f32.mrf.mxu1 }
  0xeb   :  { %1175 = vst [vmem:[%s1753_s2 + $0x118] sm:$0xff] %v1111_v60  ;;  %v1077_v0 = vsel %vm949_vm6, %v501_v56, %v1013_v59  ;;  %vm954_vm8 = vcmp.gt.f32.partialorder %v1310_v62, 0.0  ;;  %v1018_v1 = vmul.f32 0.2, %v1310_v62  ;;  %vm986_vm9 = vcmp.gt.f32.partialorder %v1342_v63, 0.0 }
  0xec   :  { %1141 = vst [vmem:[%s1753_s2 + $0x8] sm:$0xff] %v1077_v0  ;;  %v1109_v2 = vsel %vm981_vm7, %v629_v57, %v1045_v61  ;;  %v1050_v3 = vmul.f32 0.2, %v1342_v63  ;;  %v514_v4 = vpop.f32.mrf.mxu0  ;;  %v642_v5 = vpop.f32.mrf.mxu1 }
  0xed   :  { %1173 = vst [vmem:[%s1753_s2 + $0x108] sm:$0xff] %v1109_v2  ;;  %v1082_v6 = vsel %vm954_vm8, %v1310_v62, %v1018_v1  ;;  %vm952_vm10 = vcmp.gt.f32.partialorder %v514_v4, 0.0  ;;  %v1016_v7 = vmul.f32 0.2, %v514_v4  ;;  %vm984_vm11 = vcmp.gt.f32.partialorder %v642_v5, 0.0 }
  0xee   :  { %1146 = vst [vmem:[%s1753_s2 + $0x30] sm:$0xff] %v1082_v6  ;;  %v1114_v8 = vsel %vm986_vm9, %v1342_v63, %v1050_v3  ;;  %v1048_v9 = vmul.f32 0.2, %v642_v5  ;;  %v1311_v10 = vpop.f32.mrf.mxu0  ;;  %v1343_v11 = vpop.f32.mrf.mxu1 }
  0xef   :  { %1178 = vst [vmem:[%s1753_s2 + $0x130] sm:$0xff] %v1114_v8  ;;  %v1080_v12 = vsel %vm952_vm10, %v514_v4, %v1016_v7  ;;  %vm955_vm12 = vcmp.gt.f32.partialorder %v1311_v10, 0.0  ;;  %v1019_v13 = vmul.f32 0.2, %v1311_v10  ;;  %vm987_vm13 = vcmp.gt.f32.partialorder %v1343_v11, 0.0 }
  0xf0   :  { %1144 = vst [vmem:[%s1753_s2 + $0x20] sm:$0xff] %v1080_v12  ;;  %v1112_v14 = vsel %vm984_vm11, %v642_v5, %v1048_v9  ;;  %v1051_v15 = vmul.f32 0.2, %v1343_v11  ;;  %v517_v16 = vpop.f32.mrf.mxu0  ;;  %v645_v17 = vpop.f32.mrf.mxu1 }
  0xf1   :  { %1176 = vst [vmem:[%s1753_s2 + $0x120] sm:$0xff] %v1112_v14  ;;  %v1083_v18 = vsel %vm955_vm12, %v1311_v10, %v1019_v13  ;;  %vm953_vm14 = vcmp.gt.f32.partialorder %v517_v16, 0.0  ;;  %v1017_v19 = vmul.f32 0.2, %v517_v16  ;;  %vm985_vm15 = vcmp.gt.f32.partialorder %v645_v17, 0.0 }
  0xf2   :  { %1147 = vst [vmem:[%s1753_s2 + $0x38] sm:$0xff] %v1083_v18  ;;  %v1115_v20 = vsel %vm987_vm13, %v1343_v11, %v1051_v15  ;;  %v1049_v21 = vmul.f32 0.2, %v645_v17  ;;  %v1314_v22 = vpop.f32.mrf.mxu0  ;;  %v1346_v23 = vpop.f32.mrf.mxu1 }
  0xf3   :  { %1179 = vst [vmem:[%s1753_s2 + $0x138] sm:$0xff] %v1115_v20  ;;  %v1081_v24 = vsel %vm953_vm14, %v517_v16, %v1017_v19  ;;  %vm958_vm0 = vcmp.gt.f32.partialorder %v1314_v22, 0.0  ;;  %v1022_v25 = vmul.f32 0.2, %v1314_v22  ;;  %vm990_vm1 = vcmp.gt.f32.partialorder %v1346_v23, 0.0 }
  0xf4   :  { %1145 = vst [vmem:[%s1753_s2 + $0x28] sm:$0xff] %v1081_v24  ;;  %v1113_v26 = vsel %vm985_vm15, %v645_v17, %v1049_v21  ;;  %v1054_v27 = vmul.f32 0.2, %v1346_v23  ;;  %v530_v28 = vpop.f32.mrf.mxu0  ;;  %v658_v29 = vpop.f32.mrf.mxu1 }
  0xf5   :  { %1177 = vst [vmem:[%s1753_s2 + $0x128] sm:$0xff] %v1113_v26  ;;  %v1086_v30 = vsel %vm958_vm0, %v1314_v22, %v1022_v25  ;;  %vm956_vm2 = vcmp.gt.f32.partialorder %v530_v28, 0.0  ;;  %v1020_v31 = vmul.f32 0.2, %v530_v28  ;;  %vm988_vm3 = vcmp.gt.f32.partialorder %v658_v29, 0.0 }
  0xf6   :  { %1150 = vst [vmem:[%s1753_s2 + $0x50] sm:$0xff] %v1086_v30  ;;  %v1118_v32 = vsel %vm990_vm1, %v1346_v23, %v1054_v27  ;;  %v1052_v33 = vmul.f32 0.2, %v658_v29  ;;  %v1315_v34 = vpop.f32.mrf.mxu0  ;;  %v1347_v35 = vpop.f32.mrf.mxu1 }
  0xf7   :  { %1182 = vst [vmem:[%s1753_s2 + $0x150] sm:$0xff] %v1118_v32  ;;  %v1084_v36 = vsel %vm956_vm2, %v530_v28, %v1020_v31  ;;  %vm959_vm4 = vcmp.gt.f32.partialorder %v1315_v34, 0.0  ;;  %v1023_v37 = vmul.f32 0.2, %v1315_v34  ;;  %vm991_vm5 = vcmp.gt.f32.partialorder %v1347_v35, 0.0 }
  0xf8   :  { %1148 = vst [vmem:[%s1753_s2 + $0x40] sm:$0xff] %v1084_v36  ;;  %v1116_v38 = vsel %vm988_vm3, %v658_v29, %v1052_v33  ;;  %v1055_v39 = vmul.f32 0.2, %v1347_v35  ;;  %v533_v40 = vpop.f32.mrf.mxu0  ;;  %v661_v41 = vpop.f32.mrf.mxu1 }
  0xf9   :  { %1180 = vst [vmem:[%s1753_s2 + $0x140] sm:$0xff] %v1116_v38  ;;  %v1087_v42 = vsel %vm959_vm4, %v1315_v34, %v1023_v37  ;;  %vm957_vm6 = vcmp.gt.f32.partialorder %v533_v40, 0.0  ;;  %v1021_v43 = vmul.f32 0.2, %v533_v40  ;;  %vm989_vm7 = vcmp.gt.f32.partialorder %v661_v41, 0.0 }
  0xfa   :  { %1151 = vst [vmem:[%s1753_s2 + $0x58] sm:$0xff] %v1087_v42  ;;  %v1119_v44 = vsel %vm991_vm5, %v1347_v35, %v1055_v39  ;;  %v1053_v45 = vmul.f32 0.2, %v661_v41  ;;  %v1318_v46 = vpop.f32.mrf.mxu0  ;;  %v1350_v47 = vpop.f32.mrf.mxu1 }
  0xfb   :  { %1183 = vst [vmem:[%s1753_s2 + $0x158] sm:$0xff] %v1119_v44  ;;  %v1085_v48 = vsel %vm957_vm6, %v533_v40, %v1021_v43  ;;  %vm962_vm8 = vcmp.gt.f32.partialorder %v1318_v46, 0.0  ;;  %v1026_v49 = vmul.f32 0.2, %v1318_v46  ;;  %vm994_vm9 = vcmp.gt.f32.partialorder %v1350_v47, 0.0 }
  0xfc   :  { %1149 = vst [vmem:[%s1753_s2 + $0x48] sm:$0xff] %v1085_v48  ;;  %v1117_v50 = vsel %vm989_vm7, %v661_v41, %v1053_v45  ;;  %v1058_v51 = vmul.f32 0.2, %v1350_v47  ;;  %v546_v52 = vpop.f32.mrf.mxu0  ;;  %v674_v53 = vpop.f32.mrf.mxu1 }
  0xfd   :  { %1181 = vst [vmem:[%s1753_s2 + $0x148] sm:$0xff] %v1117_v50  ;;  %v1090_v54 = vsel %vm962_vm8, %v1318_v46, %v1026_v49  ;;  %vm960_vm10 = vcmp.gt.f32.partialorder %v546_v52, 0.0  ;;  %v1024_v55 = vmul.f32 0.2, %v546_v52  ;;  %vm992_vm11 = vcmp.gt.f32.partialorder %v674_v53, 0.0 }
  0xfe   :  { %1154 = vst [vmem:[%s1753_s2 + $0x70] sm:$0xff] %v1090_v54  ;;  %v1122_v56 = vsel %vm994_vm9, %v1350_v47, %v1058_v51  ;;  %v1056_v57 = vmul.f32 0.2, %v674_v53  ;;  %v1319_v58 = vpop.f32.mrf.mxu0  ;;  %v1351_v59 = vpop.f32.mrf.mxu1 }
  0xff   :  { %1186 = vst [vmem:[%s1753_s2 + $0x170] sm:$0xff] %v1122_v56  ;;  %v1088_v60 = vsel %vm960_vm10, %v546_v52, %v1024_v55  ;;  %vm963_vm12 = vcmp.gt.f32.partialorder %v1319_v58, 0.0  ;;  %v1027_v61 = vmul.f32 0.2, %v1319_v58  ;;  %vm995_vm13 = vcmp.gt.f32.partialorder %v1351_v59, 0.0 }
 0x100   :  { %1152 = vst [vmem:[%s1753_s2 + $0x60] sm:$0xff] %v1088_v60  ;;  %v1120_v62 = vsel %vm992_vm11, %v674_v53, %v1056_v57  ;;  %v1059_v63 = vmul.f32 0.2, %v1351_v59  ;;  %v549_v0 = vpop.f32.mrf.mxu0  ;;  %v677_v1 = vpop.f32.mrf.mxu1 }
 0x101   :  { %1184 = vst [vmem:[%s1753_s2 + $0x160] sm:$0xff] %v1120_v62  ;;  %v1091_v2 = vsel %vm963_vm12, %v1319_v58, %v1027_v61  ;;  %vm961_vm14 = vcmp.gt.f32.partialorder %v549_v0, 0.0  ;;  %v1025_v3 = vmul.f32 0.2, %v549_v0  ;;  %vm993_vm15 = vcmp.gt.f32.partialorder %v677_v1, 0.0 }
 0x102   :  { %1155 = vst [vmem:[%s1753_s2 + $0x78] sm:$0xff] %v1091_v2  ;;  %v1123_v4 = vsel %vm995_vm13, %v1351_v59, %v1059_v63  ;;  %v1057_v5 = vmul.f32 0.2, %v677_v1  ;;  %v1322_v6 = vpop.f32.mrf.mxu0  ;;  %v1354_v7 = vpop.f32.mrf.mxu1 }
 0x103   :  { %1187 = vst [vmem:[%s1753_s2 + $0x178] sm:$0xff] %v1123_v4  ;;  %v1089_v8 = vsel %vm961_vm14, %v549_v0, %v1025_v3  ;;  %vm966_vm0 = vcmp.gt.f32.partialorder %v1322_v6, 0.0  ;;  %v1030_v9 = vmul.f32 0.2, %v1322_v6  ;;  %vm998_vm1 = vcmp.gt.f32.partialorder %v1354_v7, 0.0 }
 0x104   :  { %1153 = vst [vmem:[%s1753_s2 + $0x68] sm:$0xff] %v1089_v8  ;;  %v1121_v10 = vsel %vm993_vm15, %v677_v1, %v1057_v5  ;;  %v1062_v11 = vmul.f32 0.2, %v1354_v7  ;;  %v562_v12 = vpop.f32.mrf.mxu0  ;;  %v690_v13 = vpop.f32.mrf.mxu1 }
 0x105   :  { %1185 = vst [vmem:[%s1753_s2 + $0x168] sm:$0xff] %v1121_v10  ;;  %v1094_v14 = vsel %vm966_vm0, %v1322_v6, %v1030_v9  ;;  %vm964_vm2 = vcmp.gt.f32.partialorder %v562_v12, 0.0  ;;  %v1028_v15 = vmul.f32 0.2, %v562_v12  ;;  %vm996_vm3 = vcmp.gt.f32.partialorder %v690_v13, 0.0 }
 0x106   :  { %1158 = vst [vmem:[%s1753_s2 + $0x90] sm:$0xff] %v1094_v14  ;;  %v1126_v16 = vsel %vm998_vm1, %v1354_v7, %v1062_v11  ;;  %v1060_v17 = vmul.f32 0.2, %v690_v13  ;;  %v1323_v18 = vpop.f32.mrf.mxu0  ;;  %v1355_v19 = vpop.f32.mrf.mxu1 }
 0x107   :  { %1190 = vst [vmem:[%s1753_s2 + $0x190] sm:$0xff] %v1126_v16  ;;  %v1092_v20 = vsel %vm964_vm2, %v562_v12, %v1028_v15  ;;  %vm967_vm4 = vcmp.gt.f32.partialorder %v1323_v18, 0.0  ;;  %v1031_v21 = vmul.f32 0.2, %v1323_v18  ;;  %vm999_vm5 = vcmp.gt.f32.partialorder %v1355_v19, 0.0 }
 0x108   :  { %1156 = vst [vmem:[%s1753_s2 + $0x80] sm:$0xff] %v1092_v20  ;;  %v1124_v22 = vsel %vm996_vm3, %v690_v13, %v1060_v17  ;;  %v1063_v23 = vmul.f32 0.2, %v1355_v19  ;;  %v565_v24 = vpop.f32.mrf.mxu0  ;;  %v693_v25 = vpop.f32.mrf.mxu1 }
 0x109   :  { %1188 = vst [vmem:[%s1753_s2 + $0x180] sm:$0xff] %v1124_v22  ;;  %v1095_v26 = vsel %vm967_vm4, %v1323_v18, %v1031_v21  ;;  %vm965_vm6 = vcmp.gt.f32.partialorder %v565_v24, 0.0  ;;  %v1029_v27 = vmul.f32 0.2, %v565_v24  ;;  %vm997_vm7 = vcmp.gt.f32.partialorder %v693_v25, 0.0 }
 0x10a   :  { %1159 = vst [vmem:[%s1753_s2 + $0x98] sm:$0xff] %v1095_v26  ;;  %v1127_v28 = vsel %vm999_vm5, %v1355_v19, %v1063_v23  ;;  %v1061_v29 = vmul.f32 0.2, %v693_v25  ;;  %v1326_v30 = vpop.f32.mrf.mxu0  ;;  %v1358_v31 = vpop.f32.mrf.mxu1 }
 0x10b   :  { %1191 = vst [vmem:[%s1753_s2 + $0x198] sm:$0xff] %v1127_v28  ;;  %v1093_v32 = vsel %vm965_vm6, %v565_v24, %v1029_v27  ;;  %vm970_vm8 = vcmp.gt.f32.partialorder %v1326_v30, 0.0  ;;  %v1034_v33 = vmul.f32 0.2, %v1326_v30  ;;  %vm1002_vm9 = vcmp.gt.f32.partialorder %v1358_v31, 0.0 }
 0x10c   :  { %1157 = vst [vmem:[%s1753_s2 + $0x88] sm:$0xff] %v1093_v32  ;;  %v1125_v34 = vsel %vm997_vm7, %v693_v25, %v1061_v29  ;;  %v1066_v35 = vmul.f32 0.2, %v1358_v31  ;;  %v578_v36 = vpop.f32.mrf.mxu0  ;;  %v706_v37 = vpop.f32.mrf.mxu1 }
 0x10d   :  { %1189 = vst [vmem:[%s1753_s2 + $0x188] sm:$0xff] %v1125_v34  ;;  %v1098_v38 = vsel %vm970_vm8, %v1326_v30, %v1034_v33  ;;  %vm968_vm10 = vcmp.gt.f32.partialorder %v578_v36, 0.0  ;;  %v1032_v39 = vmul.f32 0.2, %v578_v36  ;;  %vm1000_vm11 = vcmp.gt.f32.partialorder %v706_v37, 0.0 }
 0x10e   :  { %1162 = vst [vmem:[%s1753_s2 + $0xb0] sm:$0xff] %v1098_v38  ;;  %v1130_v40 = vsel %vm1002_vm9, %v1358_v31, %v1066_v35  ;;  %v1064_v41 = vmul.f32 0.2, %v706_v37  ;;  %v1327_v42 = vpop.f32.mrf.mxu0  ;;  %v1359_v43 = vpop.f32.mrf.mxu1 }
 0x10f   :  { %1194 = vst [vmem:[%s1753_s2 + $0x1b0] sm:$0xff] %v1130_v40  ;;  %v1096_v44 = vsel %vm968_vm10, %v578_v36, %v1032_v39  ;;  %vm971_vm12 = vcmp.gt.f32.partialorder %v1327_v42, 0.0  ;;  %v1035_v45 = vmul.f32 0.2, %v1327_v42  ;;  %vm1003_vm13 = vcmp.gt.f32.partialorder %v1359_v43, 0.0 }
 0x110   :  { %1160 = vst [vmem:[%s1753_s2 + $0xa0] sm:$0xff] %v1096_v44  ;;  %v1128_v46 = vsel %vm1000_vm11, %v706_v37, %v1064_v41  ;;  %v1067_v47 = vmul.f32 0.2, %v1359_v43  ;;  %v581_v48 = vpop.f32.mrf.mxu0  ;;  %v709_v49 = vpop.f32.mrf.mxu1 }
 0x111   :  { %1192 = vst [vmem:[%s1753_s2 + $0x1a0] sm:$0xff] %v1128_v46  ;;  %v1099_v50 = vsel %vm971_vm12, %v1327_v42, %v1035_v45  ;;  %vm969_vm14 = vcmp.gt.f32.partialorder %v581_v48, 0.0  ;;  %v1033_v51 = vmul.f32 0.2, %v581_v48  ;;  %vm1001_vm15 = vcmp.gt.f32.partialorder %v709_v49, 0.0 }
 0x112   :  { %1163 = vst [vmem:[%s1753_s2 + $0xb8] sm:$0xff] %v1099_v50  ;;  %v1131_v52 = vsel %vm1003_vm13, %v1359_v43, %v1067_v47  ;;  %v1065_v53 = vmul.f32 0.2, %v709_v49  ;;  %v1330_v54 = vpop.f32.mrf.mxu0  ;;  %v1362_v55 = vpop.f32.mrf.mxu1 }
 0x113   :  { %1195 = vst [vmem:[%s1753_s2 + $0x1b8] sm:$0xff] %v1131_v52  ;;  %v1097_v56 = vsel %vm969_vm14, %v581_v48, %v1033_v51  ;;  %vm974_vm0 = vcmp.gt.f32.partialorder %v1330_v54, 0.0  ;;  %v1038_v57 = vmul.f32 0.2, %v1330_v54  ;;  %vm1006_vm1 = vcmp.gt.f32.partialorder %v1362_v55, 0.0 }
 0x114   :  { %1161 = vst [vmem:[%s1753_s2 + $0xa8] sm:$0xff] %v1097_v56  ;;  %v1129_v58 = vsel %vm1001_vm15, %v709_v49, %v1065_v53  ;;  %v1070_v59 = vmul.f32 0.2, %v1362_v55  ;;  %v594_v60 = vpop.f32.mrf.mxu0  ;;  %v722_v61 = vpop.f32.mrf.mxu1 }
 0x115   :  { %1193 = vst [vmem:[%s1753_s2 + $0x1a8] sm:$0xff] %v1129_v58  ;;  %v1102_v62 = vsel %vm974_vm0, %v1330_v54, %v1038_v57  ;;  %vm972_vm2 = vcmp.gt.f32.partialorder %v594_v60, 0.0  ;;  %v1036_v63 = vmul.f32 0.2, %v594_v60  ;;  %vm1004_vm3 = vcmp.gt.f32.partialorder %v722_v61, 0.0 }
 0x116   :  { %1166 = vst [vmem:[%s1753_s2 + $0xd0] sm:$0xff] %v1102_v62  ;;  %v1134_v0 = vsel %vm1006_vm1, %v1362_v55, %v1070_v59  ;;  %v1068_v1 = vmul.f32 0.2, %v722_v61  ;;  %v1331_v2 = vpop.f32.mrf.mxu0  ;;  %v1363_v3 = vpop.f32.mrf.mxu1 }
 0x117   :  { %1198 = vst [vmem:[%s1753_s2 + $0x1d0] sm:$0xff] %v1134_v0  ;;  %v1100_v4 = vsel %vm972_vm2, %v594_v60, %v1036_v63  ;;  %vm975_vm4 = vcmp.gt.f32.partialorder %v1331_v2, 0.0  ;;  %v1039_v5 = vmul.f32 0.2, %v1331_v2  ;;  %vm1007_vm5 = vcmp.gt.f32.partialorder %v1363_v3, 0.0 }
 0x118   :  { %1164 = vst [vmem:[%s1753_s2 + $0xc0] sm:$0xff] %v1100_v4  ;;  %v1132_v6 = vsel %vm1004_vm3, %v722_v61, %v1068_v1  ;;  %v1071_v7 = vmul.f32 0.2, %v1363_v3  ;;  %v597_v8 = vpop.f32.mrf.mxu0  ;;  %v725_v9 = vpop.f32.mrf.mxu1 }
 0x119   :  { %1196 = vst [vmem:[%s1753_s2 + $0x1c0] sm:$0xff] %v1132_v6  ;;  %v1103_v10 = vsel %vm975_vm4, %v1331_v2, %v1039_v5  ;;  %vm973_vm6 = vcmp.gt.f32.partialorder %v597_v8, 0.0  ;;  %v1037_v11 = vmul.f32 0.2, %v597_v8  ;;  %vm1005_vm7 = vcmp.gt.f32.partialorder %v725_v9, 0.0 }
 0x11a   :  { %1167 = vst [vmem:[%s1753_s2 + $0xd8] sm:$0xff] %v1103_v10  ;;  %v1135_v12 = vsel %vm1007_vm5, %v1363_v3, %v1071_v7  ;;  %v1069_v13 = vmul.f32 0.2, %v725_v9  ;;  %v1334_v14 = vpop.f32.mrf.mxu0  ;;  %v1366_v15 = vpop.f32.mrf.mxu1 }
 0x11b   :  { %1199 = vst [vmem:[%s1753_s2 + $0x1d8] sm:$0xff] %v1135_v12  ;;  %v1101_v16 = vsel %vm973_vm6, %v597_v8, %v1037_v11  ;;  %vm978_vm8 = vcmp.gt.f32.partialorder %v1334_v14, 0.0  ;;  %v1042_v17 = vmul.f32 0.2, %v1334_v14  ;;  %vm1010_vm9 = vcmp.gt.f32.partialorder %v1366_v15, 0.0 }
 0x11c   :  { %1165 = vst [vmem:[%s1753_s2 + $0xc8] sm:$0xff] %v1101_v16  ;;  %v1133_v18 = vsel %vm1005_vm7, %v725_v9, %v1069_v13  ;;  %v1074_v19 = vmul.f32 0.2, %v1366_v15  ;;  %v610_v20 = vpop.f32.mrf.mxu0  ;;  %v738_v21 = vpop.f32.mrf.mxu1 }
 0x11d   :  { %1197 = vst [vmem:[%s1753_s2 + $0x1c8] sm:$0xff] %v1133_v18  ;;  %v1106_v22 = vsel %vm978_vm8, %v1334_v14, %v1042_v17  ;;  %vm976_vm10 = vcmp.gt.f32.partialorder %v610_v20, 0.0  ;;  %v1040_v23 = vmul.f32 0.2, %v610_v20  ;;  %vm1008_vm11 = vcmp.gt.f32.partialorder %v738_v21, 0.0 }
 0x11e   :  { %1170 = vst [vmem:[%s1753_s2 + $0xf0] sm:$0xff] %v1106_v22  ;;  %v1138_v24 = vsel %vm1010_vm9, %v1366_v15, %v1074_v19  ;;  %v1072_v25 = vmul.f32 0.2, %v738_v21  ;;  %v1335_v26 = vpop.f32.mrf.mxu0  ;;  %v1367_v27 = vpop.f32.mrf.mxu1 }
 0x11f   :  { %1202 = vst [vmem:[%s1753_s2 + $0x1f0] sm:$0xff] %v1138_v24  ;;  %v1104_v28 = vsel %vm976_vm10, %v610_v20, %v1040_v23  ;;  %vm979_vm12 = vcmp.gt.f32.partialorder %v1335_v26, 0.0  ;;  %v1043_v29 = vmul.f32 0.2, %v1335_v26  ;;  %vm1011_vm13 = vcmp.gt.f32.partialorder %v1367_v27, 0.0 }
 0x120   :  { %1168 = vst [vmem:[%s1753_s2 + $0xe0] sm:$0xff] %v1104_v28  ;;  %v1136_v30 = vsel %vm1008_vm11, %v738_v21, %v1072_v25  ;;  %v1075_v31 = vmul.f32 0.2, %v1367_v27  ;;  %v613_v32 = vpop.f32.mrf.mxu0  ;;  %v741_v33 = vpop.f32.mrf.mxu1 }
 0x121   :  { %1200 = vst [vmem:[%s1753_s2 + $0x1e0] sm:$0xff] %v1136_v30  ;;  %v1107_v34 = vsel %vm979_vm12, %v1335_v26, %v1043_v29  ;;  %vm977_vm14 = vcmp.gt.f32.partialorder %v613_v32, 0.0  ;;  %v1041_v35 = vmul.f32 0.2, %v613_v32  ;;  %vm1009_vm15 = vcmp.gt.f32.partialorder %v741_v33, 0.0 }
 0x122   :  { %1171 = vst [vmem:[%s1753_s2 + $0xf8] sm:$0xff] %v1107_v34  ;;  %v1139_v36 = vsel %vm1011_vm13, %v1367_v27, %v1075_v31  ;;  %v1073_v37 = vmul.f32 0.2, %v741_v33 }
 0x123   :  { %1203 = vst [vmem:[%s1753_s2 + $0x1f8] sm:$0xff] %v1139_v36  ;;  %v1105_v38 = vsel %vm977_vm14, %v613_v32, %v1041_v35 }
 0x124   :  { %1169 = vst [vmem:[%s1753_s2 + $0xe8] sm:$0xff] %v1105_v38  ;;  %v1137_v39 = vsel %vm1009_vm15, %v741_v33, %v1073_v37 }
 0x125   :  { %1201 = vst [vmem:[%s1753_s2 + $0x1e8] sm:$0xff] %v1137_v39 }

// kernel: _forward.9
= control target key start
LH: loop header
LB: loop body
LE: loop exit
PB: predicated region body
PF: predicated region fallthrough
CT: control target
= control target key end

     0   :  { %s551_s1 = inlined_call_operand.vmem [shape: bf16[128,128], index: 1, kind: input, shape index: {}]   ;;  %s552_s0 = inlined_call_operand.vmem [shape: bf16[128,128], index: 0, kind: input, shape index: {}]   ;;  %s553_s2 = inlined_call_operand.vmem [shape: f32[128,128], index: 2, kind: output, shape index: {}]  }
   0x1   :  { %v424_v0 = vld [vmem:[%s551_s1 + $0x38] sm:$0xff]   ;;  %v425_v1 = vld [vmem:[%s551_s1 + $0x30] sm:$0xff]   ;;  %v426_v2 = vld [vmem:[%s551_s1 + $0x28] sm:$0xff]  }
   0x2   :  { %376 = vmatprep.subr.bf16.mxu0 %v424_v0  ;;  %408 = vmatprep.subr.bf16.mxu1 %v424_v0  ;;  %v427_v3 = vld [vmem:[%s551_s1 + $0x20] sm:$0xff]   ;;  %v428_v6 = vld [vmem:[%s551_s1 + $0x18] sm:$0xff]   ;;  %v429_v7 = vld [vmem:[%s551_s1 + $0x10] sm:$0xff]  }
   0x3   :  { %377 = vmatpush3.bf16.msra.mxu0 %v424_v0  ;;  %416 = vmatpush3.bf16.msra.mxu1 %v424_v0  ;;  %v432_v4 = vld [vmem:[%s552_s0] sm:$0xff]   ;;  %v430_v8 = vld [vmem:[%s551_s1 + $0x8] sm:$0xff]   ;;  %v436_v12 = vld [vmem:[%s552_s0 + $0x10] sm:$0xff]  }
   0x4   :  { %378 = vmatprep.subr.bf16.mxu0 %v425_v1  ;;  %409 = vmatprep.subr.bf16.mxu1 %v425_v1  ;;  %v433_v5 = vld [vmem:[%s552_s0 + $0x20] sm:$0xff]   ;;  %v434_v10 = vld [vmem:[%s552_s0 + $0x8] sm:$0xff]   ;;  %v437_v13 = vld [vmem:[%s552_s0 + $0x30] sm:$0xff]  }
   0x5   :  { %392 = vmatprep.mubr.bf16.mxu0 %v432_v4  ;;  %400 = vmatprep.mubr.bf16.mxu1 %v433_v5  ;;  %v431_v9 = vld [vmem:[%s551_s1] sm:$0xff]   ;;  %v435_v11 = vld [vmem:[%s552_s0 + $0x28] sm:$0xff]   ;;  %v438_v14 = vld [vmem:[%s552_s0 + $0x18] sm:$0xff]  }
   0x6   :  { %v439_v15 = vld [vmem:[%s552_s0 + $0x38] sm:$0xff]  }
   0x7   :  { %379 = vmatpush3.bf16.msra.mxu0 %v425_v1  ;;  %417 = vmatpush3.bf16.msra.mxu1 %v425_v1 }
   0x8   :  { %380 = vmatprep.subr.bf16.mxu0 %v426_v2  ;;  %410 = vmatprep.subr.bf16.mxu1 %v426_v2 }
   0xb   :  { %381 = vmatpush3.bf16.msra.mxu0 %v426_v2  ;;  %418 = vmatpush3.bf16.msra.mxu1 %v426_v2 }
   0xc   :  { %382 = vmatprep.subr.bf16.mxu0 %v427_v3  ;;  %411 = vmatprep.subr.bf16.mxu1 %v427_v3 }
   0xf   :  { %383 = vmatpush3.bf16.msra.mxu0 %v427_v3  ;;  %419 = vmatpush3.bf16.msra.mxu1 %v427_v3 }
  0x10   :  { %384 = vmatprep.subr.bf16.mxu0 %v428_v6  ;;  %412 = vmatprep.subr.bf16.mxu1 %v428_v6 }
  0x13   :  { %385 = vmatpush3.bf16.msra.mxu0 %v428_v6  ;;  %420 = vmatpush3.bf16.msra.mxu1 %v428_v6 }
  0x14   :  { %386 = vmatprep.subr.bf16.mxu0 %v429_v7  ;;  %413 = vmatprep.subr.bf16.mxu1 %v429_v7 }
  0x17   :  { %387 = vmatpush3.bf16.msra.mxu0 %v429_v7  ;;  %421 = vmatpush3.bf16.msra.mxu1 %v429_v7 }
  0x18   :  { %388 = vmatprep.subr.bf16.mxu0 %v430_v8  ;;  %414 = vmatprep.subr.bf16.mxu1 %v430_v8 }
  0x1b   :  { %389 = vmatpush3.bf16.msra.mxu0 %v430_v8  ;;  %422 = vmatpush3.bf16.msra.mxu1 %v430_v8 }
  0x1c   :  { %390 = vmatprep.subr.bf16.mxu0 %v431_v9  ;;  %415 = vmatprep.subr.bf16.mxu1 %v431_v9 }
  0x1f   :  { %391 = vmatpush3.bf16.msra.mxu0 %v431_v9  ;;  %423 = vmatpush3.bf16.msra.mxu1 %v431_v9 }
  0x22   :  { %393 = vmatmul.mubr.bf16.vlgmr.msra.gmra.mxu0 %v434_v10  ;;  %401 = vmatmul.mubr.bf16.vlgmr.msra.gmra.mxu1 %v435_v11 }
  0x23   :  { %396 = vmatprep.mubr.bf16.mxu0 %v436_v12  ;;  %404 = vmatprep.mubr.bf16.mxu1 %v437_v13 }
  0x2a   :  { %397 = vmatmul.mubr.bf16.gmra.mxu0 %v438_v14  ;;  %405 = vmatmul.mubr.bf16.gmra.mxu1 %v439_v15 }
  0xe2   :  { %v394_v16 = vpop.f32.mrf.mxu0  ;;  %v402_v17 = vpop.f32.mrf.mxu1 }
  0xe3   :  { %326 = vst [vmem:[%s553_s2 + $0x10] sm:$0xff] %v394_v16  ;;  %334 = vst [vmem:[%s553_s2 + $0x50] sm:$0xff] %v402_v17 }
  0xe4   :  { %v210_v18 = vpop.f32.mrf.mxu0  ;;  %v242_v19 = vpop.f32.mrf.mxu1 }
  0xe5   :  { %324 = vst [vmem:[%s553_s2] sm:$0xff] %v210_v18  ;;  %332 = vst [vmem:[%s553_s2 + $0x40] sm:$0xff] %v242_v19 }
  0xe6   :  { %v395_v20 = vpop.f32.mrf.mxu0  ;;  %v403_v21 = vpop.f32.mrf.mxu1 }
  0xe7   :  { %327 = vst [vmem:[%s553_s2 + $0x18] sm:$0xff] %v395_v20  ;;  %335 = vst [vmem:[%s553_s2 + $0x58] sm:$0xff] %v403_v21 }
  0xe8   :  { %v213_v22 = vpop.f32.mrf.mxu0  ;;  %v245_v23 = vpop.f32.mrf.mxu1 }
  0xe9   :  { %325 = vst [vmem:[%s553_s2 + $0x8] sm:$0xff] %v213_v22  ;;  %333 = vst [vmem:[%s553_s2 + $0x48] sm:$0xff] %v245_v23 }
  0xea   :  { %v398_v24 = vpop.f32.mrf.mxu0  ;;  %v406_v25 = vpop.f32.mrf.mxu1 }
  0xeb   :  { %330 = vst [vmem:[%s553_s2 + $0x30] sm:$0xff] %v398_v24  ;;  %338 = vst [vmem:[%s553_s2 + $0x70] sm:$0xff] %v406_v25 }
  0xec   :  { %v226_v26 = vpop.f32.mrf.mxu0  ;;  %v258_v27 = vpop.f32.mrf.mxu1 }
  0xed   :  { %328 = vst [vmem:[%s553_s2 + $0x20] sm:$0xff] %v226_v26  ;;  %336 = vst [vmem:[%s553_s2 + $0x60] sm:$0xff] %v258_v27 }
  0xee   :  { %v399_v28 = vpop.f32.mrf.mxu0  ;;  %v407_v29 = vpop.f32.mrf.mxu1 }
  0xef   :  { %331 = vst [vmem:[%s553_s2 + $0x38] sm:$0xff] %v399_v28  ;;  %339 = vst [vmem:[%s553_s2 + $0x78] sm:$0xff] %v407_v29 }
  0xf0   :  { %v229_v30 = vpop.f32.mrf.mxu0  ;;  %v261_v31 = vpop.f32.mrf.mxu1 }
  0xf1   :  { %329 = vst [vmem:[%s553_s2 + $0x28] sm:$0xff] %v229_v30  ;;  %337 = vst [vmem:[%s553_s2 + $0x68] sm:$0xff] %v261_v31 }

// kernel: _forward.10
= control target key start
LH: loop header
LB: loop body
LE: loop exit
PB: predicated region body
PF: predicated region fallthrough
CT: control target
= control target key end

     0   :  { %s419_s6 = smov 0   ;;  %s421_s7 = smov 0   ;;  %s529_s0 = inlined_call_operand.vmem [shape: f32[2,64,16], index: 0, kind: input, shape index: {}]   ;;  %s530_s1 = inlined_call_operand.vmem [shape: f32[2,64,16], index: 1, kind: output, shape index: {}]  }
   0x1   :  { %s423_s8 = smov 0  }
   0x2 LB: > { %s23_s9 = sadd.s32 1, %s403_s7  ;;  %p350_p0 = scmp.ge.s32.totalorder %s407_s8, 1  ;;  %s407_s8 = sphi %s423_s8, %s11_s8   ;;  %s403_s7 = sphi %s421_s7, %s532_s7   ;;  %s399_s6 = sphi %s419_s6, %s531_s6  }
   0x3   : > { %p25_p1 = scmp.ge.s32.totalorder %s23_s9, 2  ;;  %p106_p2 = scmp.lt.s32.totalorder %s407_s8, 3 }
   0x5   : > { %s534_s9 = smov (%p25_p1, %s23_s9), 0  ;;  %p107_p3 = pnand %p350_p0, %p106_p2 }
   0x6   : > { %p132_p4 = scmp.lt.s32.totalorder (!%p107_p3), %s399_s6, 1 }
   0x7   : > { %110 = sbr.rel (%p107_p3) target bundleno = 79 (0x4f), region = 24 }
   0xc   : > { %s536_s6 = smov (!%p132_p4, %s399_s6), 1  ;;  %vm156_vm0 = vcmask 130048  }
   0xd   : > { %s357_s10 = sshll.u32 %s536_s6, 6 }
   0xe   : > { %s139_s13 = scalar_lea.vmem %s529_s0, %s357_s10  ;;  %s502_s16 = scalar_lea.vmem %s530_s1, %s357_s10 }
   0xf   : > { %v445_v0 = vld [vmem:[%s139_s13] sm:$0xff]  ;;  %v447_v1 = vld [vmem:[%s139_s13 + $0x8] sm:$0xff]  ;;  %v449_v2 = vld [vmem:[%s139_s13 + $0x10] sm:$0xff] }
  0x10   : > { %v451_v3 = vld [vmem:[%s139_s13 + $0x18] sm:$0xff]  ;;  %v157_v4 = vsel %vm156_vm0, %v445_v0, 0.0  ;;  %v158_v5 = vsel %vm156_vm0, %v447_v1, 0.0  ;;  %v160_v6 = vsel %vm156_vm0, %v449_v2, 0.0  ;;  %v180_v7 = vmul.f32 %v445_v0, %v445_v0  ;;  %v461_v8 = vld [vmem:[%s139_s13 + $0x20] sm:$0xff]  ;;  %v469_v13 = vld [vmem:[%s139_s13 + $0x28] sm:$0xff] }
  0x11   : > { %v159_v9 = vadd.f32 %v158_v5, %v157_v4  ;;  %v162_v10 = vsel %vm156_vm0, %v451_v3, 0.0  ;;  %v181_v11 = vmul.f32 %v447_v1, %v447_v1  ;;  %v182_v12 = vmul.f32 %v449_v2, %v449_v2  ;;  %v154_v20 = vld [vmem:[%s139_s13 + $0x30] sm:$0xff]  ;;  %v155_v27 = vld [vmem:[%s139_s13 + $0x38] sm:$0xff] }
  0x12   : > { %v183_v15 = vmul.f32 %v451_v3, %v451_v3  ;;  %v164_v16 = vsel %vm156_vm0, %v461_v8, 0.0  ;;  %v184_v17 = vmul.f32 %v461_v8, %v461_v8  ;;  %v188_v18 = vsel %vm156_vm0, %v180_v7, 0.0 }
  0x13   : > { %v161_v14 = vadd.f32 %v160_v6, %v159_v9  ;;  %v189_v19 = vsel %vm156_vm0, %v181_v11, 0.0  ;;  %v191_v23 = vsel %vm156_vm0, %v182_v12, 0.0  ;;  %v166_v24 = vsel %vm156_vm0, %v469_v13, 0.0 }
  0x14   : > { %v190_v22 = vadd.f32 %v189_v19, %v188_v18  ;;  %v185_v25 = vmul.f32 %v469_v13, %v469_v13  ;;  %v193_v26 = vsel %vm156_vm0, %v183_v15, 0.0  ;;  %v168_v30 = vsel %vm156_vm0, %v154_v20, 0.0 }
  0x15   : > { %v163_v21 = vadd.f32 %v162_v10, %v161_v14  ;;  %v186_v31 = vmul.f32 %v154_v20, %v154_v20  ;;  %v195_v32 = vsel %vm156_vm0, %v184_v17, 0.0  ;;  %v170_v35 = vsel %vm156_vm0, %v155_v27, 0.0 }
  0x16   : > { %v192_v29 = vadd.f32 %v191_v23, %v190_v22  ;;  %v187_v36 = vmul.f32 %v155_v27, %v155_v27  ;;  %v197_v37 = vsel %vm156_vm0, %v185_v25, 0.0 }
  0x17   : > { %v165_v28 = vadd.f32 %v164_v16, %v163_v21  ;;  %v199_v40 = vsel %vm156_vm0, %v186_v31, 0.0 }
  0x18   : > { %v194_v34 = vadd.f32 %v193_v26, %v192_v29  ;;  %v201_v43 = vsel %vm156_vm0, %v187_v36, 0.0 }
  0x19   : > { %v167_v33 = vadd.f32 %v166_v24, %v165_v28 }
  0x1a   : > { %v196_v39 = vadd.f32 %v195_v32, %v194_v34 }
  0x1b   : > { %v169_v38 = vadd.f32 %v168_v30, %v167_v33 }
  0x1c   : > { %v198_v42 = vadd.f32 %v197_v37, %v196_v39 }
  0x1d   : > { %v171_v41 = vadd.f32 %v170_v35, %v169_v38 }
  0x1e   : > { %v200_v45 = vadd.f32 %v199_v40, %v198_v42 }
  0x1f   : > { %v172_v44 = vrot.slane %v171_v41, 4 }
  0x20   : > { %v202_v47 = vadd.f32 %v201_v43, %v200_v45 }
  0x21   : > { %v173_v46 = vadd.f32 %v172_v44, %v171_v41 }
  0x22   : > { %v203_v49 = vrot.slane %v202_v47, 4 }
  0x23   : > { %v174_v48 = vrot.slane %v173_v46, 2 }
  0x24   : > { %v204_v51 = vadd.f32 %v203_v49, %v202_v47 }
  0x25   : > { %v175_v50 = vadd.f32 %v174_v48, %v173_v46 }
  0x26   : > { %v205_v53 = vrot.slane %v204_v51, 2 }
  0x27   : > { %v176_v52 = vrot.slane %v175_v50, 1 }
  0x28   : > { %v206_v55 = vadd.f32 %v205_v53, %v204_v51 }
  0x29   : > { %v177_v54 = vadd.f32 %v176_v52, %v175_v50 }
  0x2a   : > { %v207_v57 = vrot.slane %v206_v55, 1 }
  0x2b   : > { %v179_v56 = vmul.f32 0.015625, %v177_v54 }
  0x2c   : > { %v208_v58 = vadd.f32 %v207_v57, %v206_v55 }
  0x2d   : > { %v210_v59 = vmul.f32 %v179_v56, %v179_v56  ;;  %v213_v4 = vsub.f32 %v445_v0, %v179_v56  ;;  %v214_v5 = vsub.f32 %v447_v1, %v179_v56  ;;  %v215_v6 = vsub.f32 %v449_v2, %v179_v56 }
  0x2e   : > { %v209_v60 = vmul.f32 0.015625, %v208_v58  ;;  %v216_v7 = vsub.f32 %v451_v3, %v179_v56  ;;  %v217_v9 = vsub.f32 %v461_v8, %v179_v56  ;;  %v218_v10 = vsub.f32 %v469_v13, %v179_v56 }
  0x2f   : > { %v219_v11 = vsub.f32 %v154_v20, %v179_v56  ;;  %v220_v12 = vsub.f32 %v155_v27, %v179_v56 }
  0x30   : > { %v211_v61 = vsub.f32 %v209_v60, %v210_v59 }
  0x32   : > { %v212_v62 = vmax.f32 %v211_v61, 0.0 }
  0x34   : > { %v221_v63 = vadd.f32 1e-05, %v212_v62 }
  0x36   : > { %383 = vrsqrt.f32 %v221_v63 }
  0x43   : > { %v384_v14 = vpop.eup %383 }
  0x44   : > { %v223_v15 = vmul.f32 %v384_v14, %v213_v4  ;;  %v224_v16 = vmul.f32 %v384_v14, %v214_v5  ;;  %v225_v17 = vmul.f32 %v384_v14, %v215_v6  ;;  %v226_v18 = vmul.f32 %v384_v14, %v216_v7 }
  0x45   : > { %v227_v19 = vmul.f32 %v384_v14, %v217_v9  ;;  %v228_v0 = vmul.f32 %v384_v14, %v218_v10  ;;  %v229_v21 = vmul.f32 %v384_v14, %v219_v11  ;;  %v230_v1 = vmul.f32 %v384_v14, %v220_v12 }
  0x46   : > { %vm231_vm1 = vcmp.gt.f32.partialorder %v223_v15, 0.0  ;;  %v239_v2 = vmul.f32 0.2, %v223_v15  ;;  %vm232_vm2 = vcmp.gt.f32.partialorder %v224_v16, 0.0  ;;  %v240_v3 = vmul.f32 0.2, %v224_v16 }
  0x47   : > { %vm233_vm3 = vcmp.gt.f32.partialorder %v225_v17, 0.0  ;;  %v241_v8 = vmul.f32 0.2, %v225_v17  ;;  %vm234_vm4 = vcmp.gt.f32.partialorder %v226_v18, 0.0  ;;  %v242_v13 = vmul.f32 0.2, %v226_v18 }
  0x48   : > { %v247_v20 = vsel %vm231_vm1, %v223_v15, %v239_v2  ;;  %v248_v22 = vsel %vm232_vm2, %v224_v16, %v240_v3  ;;  %vm235_vm5 = vcmp.gt.f32.partialorder %v227_v19, 0.0  ;;  %v243_v23 = vmul.f32 0.2, %v227_v19 }
  0x49   : > { %255 = vst.msk [vmem:[%s502_s16] sm:$0xff] %vm156_vm0, %v247_v20  ;;  %256 = vst.msk [vmem:[%s502_s16 + $0x8] sm:$0xff] %vm156_vm0, %v248_v22  ;;  %v249_v24 = vsel %vm233_vm3, %v225_v17, %v241_v8  ;;  %v250_v25 = vsel %vm234_vm4, %v226_v18, %v242_v13  ;;  %vm236_vm6 = vcmp.gt.f32.partialorder %v228_v0, 0.0  ;;  %v244_v26 = vmul.f32 0.2, %v228_v0 }
  0x4a   : > { %257 = vst.msk [vmem:[%s502_s16 + $0x10] sm:$0xff] %vm156_vm0, %v249_v24  ;;  %258 = vst.msk [vmem:[%s502_s16 + $0x18] sm:$0xff] %vm156_vm0, %v250_v25  ;;  %v251_v27 = vsel %vm235_vm5, %v227_v19, %v243_v23  ;;  %vm237_vm7 = vcmp.gt.f32.partialorder %v229_v21, 0.0  ;;  %v245_v28 = vmul.f32 0.2, %v229_v21  ;;  %vm238_vm8 = vcmp.gt.f32.partialorder %v230_v1, 0.0 }
  0x4b   : > { %259 = vst.msk [vmem:[%s502_s16 + $0x20] sm:$0xff] %vm156_vm0, %v251_v27  ;;  %v252_v29 = vsel %vm236_vm6, %v228_v0, %v244_v26  ;;  %v246_v30 = vmul.f32 0.2, %v230_v1 }
  0x4c   : > { %260 = vst.msk [vmem:[%s502_s16 + $0x28] sm:$0xff] %vm156_vm0, %v252_v29  ;;  %v253_v31 = vsel %vm237_vm7, %v229_v21, %v245_v28 }
  0x4d   : > { %261 = vst.msk [vmem:[%s502_s16 + $0x30] sm:$0xff] %vm156_vm0, %v253_v31  ;;  %v254_v32 = vsel %vm238_vm8, %v230_v1, %v246_v30 }
  0x4e   : > { %262 = vst.msk [vmem:[%s502_s16 + $0x38] sm:$0xff] %vm156_vm0, %v254_v32 }
  0x4f PF: > { %s11_s8 = sadd.s32 1, %s407_s8   ;;  %s531_s6 = smov %s403_s7 }
  0x50   : > { %p8_p5 = scmp.ge.s32.totalorder %s11_s8, 4   ;;  %s532_s7 = smov %s534_s9 }
  0x52   :  { %10 = sbr.rel (!%p8_p5) target bundleno = 2 (0x2), region = 54 }

// kernel: _forward.11
= control target key start
LH: loop header
LB: loop body
LE: loop exit
PB: predicated region body
PF: predicated region fallthrough
CT: control target
= control target key end

     0   :  { %s421_s1 = inlined_call_operand.vmem [shape: bf16[256,128], index: 1, kind: input, shape index: {}]   ;;  %s422_s0 = inlined_call_operand.vmem [shape: bf16[32,256], index: 0, kind: input, shape index: {}]   ;;  %s423_s2 = inlined_call_operand.vmem [shape: f32[32,128], index: 2, kind: output, shape index: {}]  }
   0x1   :  { %v312_v0 = vld [vmem:[%s421_s1 + $0x78] sm:$0xff]   ;;  %v314_v2 = vld [vmem:[%s421_s1 + $0x70] sm:$0xff]   ;;  %v316_v4 = vld [vmem:[%s421_s1 + $0x68] sm:$0xff]  }
   0x2   :  { %v313_v1 = vld [vmem:[%s421_s1 + $0x38] sm:$0xff]   ;;  %268 = vmatprep.subr.bf16.mxu0 %v312_v0  ;;  %296 = vmatprep.subr.bf16.mxu1 %v312_v0  ;;  %v315_v3 = vld [vmem:[%s421_s1 + $0x30] sm:$0xff]   ;;  %v317_v5 = vld [vmem:[%s421_s1 + $0x28] sm:$0xff]  }
   0x3   :  { %269 = vmatpush3.bf16.msra.mxu0 %v313_v1  ;;  %304 = vmatpush3.bf16.msra.mxu1 %v313_v1  ;;  %v318_v6 = vld [vmem:[%s421_s1 + $0x60] sm:$0xff]   ;;  %v320_v8 = vld [vmem:[%s421_s1 + $0x58] sm:$0xff]   ;;  %v322_v10 = vld [vmem:[%s421_s1 + $0x50] sm:$0xff]  }
   0x4   :  { %270 = vmatprep.subr.bf16.mxu0 %v314_v2  ;;  %297 = vmatprep.subr.bf16.mxu1 %v314_v2  ;;  %v319_v7 = vld [vmem:[%s421_s1 + $0x20] sm:$0xff]   ;;  %v321_v9 = vld [vmem:[%s421_s1 + $0x18] sm:$0xff]   ;;  %v323_v13 = vld [vmem:[%s421_s1 + $0x10] sm:$0xff]  }
   0x5   :  { %v330_v11 = vld [vmem:[%s422_s0 + $0x4] ss:$8 sps:$4 sm:$0xff]   ;;  %v333_v12 = vld [vmem:[%s422_s0 + $0x14] ss:$8 sps:$4 sm:$0xff]   ;;  %v328_v18 = vld [vmem:[%s422_s0] ss:$8 sps:$4 sm:$0xff]  }
   0x6   :  { %v324_v14 = vld [vmem:[%s421_s1 + $0x48] sm:$0xff]   ;;  %208 = vmatprep.mubr.bf16.mxu0 %v330_v11  ;;  %216 = vmatprep.mubr.bf16.mxu1 %v333_v12  ;;  %v326_v16 = vld [vmem:[%s421_s1 + $0x40] sm:$0xff]   ;;  %v331_v19 = vld [vmem:[%s422_s0 + $0x10] ss:$8 sps:$4 sm:$0xff]  }
   0x7   :  { %271 = vmatpush3.bf16.msra.mxu0 %v315_v3  ;;  %305 = vmatpush3.bf16.msra.mxu1 %v315_v3  ;;  %v325_v15 = vld [vmem:[%s421_s1 + $0x8] sm:$0xff]   ;;  %v327_v17 = vld [vmem:[%s421_s1] sm:$0xff]  }
   0x8   :  { %272 = vmatprep.subr.bf16.mxu0 %v316_v4  ;;  %298 = vmatprep.subr.bf16.mxu1 %v316_v4 }
   0xb   :  { %273 = vmatpush3.bf16.msra.mxu0 %v317_v5  ;;  %306 = vmatpush3.bf16.msra.mxu1 %v317_v5 }
   0xc   :  { %274 = vmatprep.subr.bf16.mxu0 %v318_v6  ;;  %299 = vmatprep.subr.bf16.mxu1 %v318_v6 }
   0xf   :  { %275 = vmatpush3.bf16.msra.mxu0 %v319_v7  ;;  %307 = vmatpush3.bf16.msra.mxu1 %v319_v7 }
  0x10   :  { %276 = vmatprep.subr.bf16.mxu0 %v320_v8  ;;  %300 = vmatprep.subr.bf16.mxu1 %v320_v8 }
  0x13   :  { %277 = vmatpush3.bf16.msra.mxu0 %v321_v9  ;;  %308 = vmatpush3.bf16.msra.mxu1 %v321_v9 }
  0x14   :  { %278 = vmatprep.subr.bf16.mxu0 %v322_v10  ;;  %301 = vmatprep.subr.bf16.mxu1 %v322_v10 }
  0x17   :  { %279 = vmatpush3.bf16.msra.mxu0 %v323_v13  ;;  %309 = vmatpush3.bf16.msra.mxu1 %v323_v13 }
  0x18   :  { %280 = vmatprep.subr.bf16.mxu0 %v324_v14  ;;  %302 = vmatprep.subr.bf16.mxu1 %v324_v14 }
  0x1b   :  { %281 = vmatpush3.bf16.msra.mxu0 %v325_v15  ;;  %310 = vmatpush3.bf16.msra.mxu1 %v325_v15 }
  0x1c   :  { %282 = vmatprep.subr.bf16.mxu0 %v326_v16  ;;  %303 = vmatprep.subr.bf16.mxu1 %v326_v16 }
  0x1f   :  { %283 = vmatpush3.bf16.msra.mxu0 %v327_v17  ;;  %311 = vmatpush3.bf16.msra.mxu1 %v327_v17 }
  0x22   :  { %209 = vmatmul.mubr.bf16.vlgmr.msra.gmra.mxu0 %v328_v18  ;;  %217 = vmatmul.mubr.bf16.vlgmr.msra.gmra.mxu1 %v331_v19 }
  0xe2   :  { %v284_v20 = vpop.f32.mrf.mxu0  ;;  %v290_v21 = vpop.f32.mrf.mxu1 }
  0xe4   :  { %v285_v22 = vpop.f32.mrf.mxu0  ;;  %v291_v23 = vpop.f32.mrf.mxu1 }
  0xe5   :  { %v286_v24 = vadd.f32 %v285_v22, %v284_v20  ;;  %v292_v25 = vadd.f32 %v291_v23, %v290_v21 }
  0xe6   :  { %v287_v26 = vpop.f32.mrf.mxu0  ;;  %v293_v27 = vpop.f32.mrf.mxu1 }
  0xe7   :  { %240 = vst [vmem:[%s423_s2] sm:$0xff] %v286_v24  ;;  %242 = vst [vmem:[%s423_s2 + $0x10] sm:$0xff] %v292_v25 }
  0xe8   :  { %v288_v28 = vpop.f32.mrf.mxu0  ;;  %v294_v29 = vpop.f32.mrf.mxu1 }
  0xe9   :  { %v289_v30 = vadd.f32 %v288_v28, %v287_v26  ;;  %v295_v31 = vadd.f32 %v294_v29, %v293_v27 }
  0xeb   :  { %241 = vst [vmem:[%s423_s2 + $0x8] sm:$0xff] %v289_v30  ;;  %243 = vst [vmem:[%s423_s2 + $0x18] sm:$0xff] %v295_v31 }

// kernel: _forward.12
= control target key start
LH: loop header
LB: loop body
LE: loop exit
PB: predicated region body
PF: predicated region fallthrough
CT: control target
= control target key end

     0   :  { %s347_s6 = smov 0   ;;  %s349_s7 = smov 0   ;;  %s393_s0 = inlined_call_operand.vmem [shape: f32[2,16,32], index: 0, kind: input, shape index: {}]   ;;  %s394_s1 = inlined_call_operand.vmem [shape: f32[2,16,32], index: 1, kind: output, shape index: {}]  }
   0x1   :  { %s351_s8 = smov 0  }
   0x2 LB: > { %s23_s9 = sadd.s32 1, %s331_s7  ;;  %p278_p0 = scmp.ge.s32.totalorder %s335_s8, 1  ;;  %s335_s8 = sphi %s351_s8, %s11_s8   ;;  %s331_s7 = sphi %s349_s7, %s396_s7   ;;  %s327_s6 = sphi %s347_s6, %s395_s6  }
   0x3   : > { %p25_p1 = scmp.ge.s32.totalorder %s23_s9, 2  ;;  %p106_p2 = scmp.lt.s32.totalorder %s335_s8, 3 }
   0x5   : > { %s398_s9 = smov (%p25_p1, %s23_s9), 0  ;;  %p107_p3 = pnand %p278_p0, %p106_p2 }
   0x6   : > { %p132_p4 = scmp.lt.s32.totalorder (!%p107_p3), %s327_s6, 1 }
   0x7   : > { %110 = sbr.rel (%p107_p3) target bundleno = 61 (0x3d), region = 24 }
   0xc   : > { %s400_s6 = smov (!%p132_p4, %s327_s6), 1  ;;  %vm150_vm0 = vcmask 261120  }
   0xd   : > { %s285_s10 = sshll.u32 %s400_s6, 4 }
   0xe   : > { %s139_s13 = scalar_lea.vmem %s393_s0, %s285_s10  ;;  %s147_s16 = scalar_lea.vmem %s394_s1, %s285_s10 }
   0xf   : > { %v148_v0 = vld [vmem:[%s139_s13] sm:$0xff]  ;;  %v149_v1 = vld [vmem:[%s139_s13 + $0x8] sm:$0xff] }
  0x10   : > { %v151_v2 = vsel %vm150_vm0, %v148_v0, 0.0  ;;  %v152_v3 = vsel %vm150_vm0, %v149_v1, 0.0  ;;  %v162_v4 = vmul.f32 %v148_v0, %v148_v0  ;;  %v163_v5 = vmul.f32 %v149_v1, %v149_v1 }
  0x11   : > { %v153_v6 = vadd.f32 %v152_v3, %v151_v2 }
  0x12   : > { %v164_v7 = vsel %vm150_vm0, %v162_v4, 0.0  ;;  %v165_v8 = vsel %vm150_vm0, %v163_v5, 0.0 }
  0x13   : > { %v154_v9 = vrot.slane %v153_v6, 4  ;;  %v166_v10 = vadd.f32 %v165_v8, %v164_v7 }
  0x15   : > { %v155_v11 = vadd.f32 %v154_v9, %v153_v6  ;;  %v167_v12 = vrot.slane %v166_v10, 4 }
  0x17   : > { %v156_v13 = vrot.slane %v155_v11, 2  ;;  %v168_v14 = vadd.f32 %v167_v12, %v166_v10 }
  0x19   : > { %v157_v15 = vadd.f32 %v156_v13, %v155_v11  ;;  %v169_v16 = vrot.slane %v168_v14, 2 }
  0x1b   : > { %v158_v17 = vrot.slane %v157_v15, 1  ;;  %v170_v18 = vadd.f32 %v169_v16, %v168_v14 }
  0x1d   : > { %v159_v19 = vadd.f32 %v158_v17, %v157_v15  ;;  %v171_v20 = vrot.slane %v170_v18, 1 }
  0x1f   : > { %v161_v21 = vmul.f32 0.0625, %v159_v19  ;;  %v172_v22 = vadd.f32 %v171_v20, %v170_v18 }
  0x21   : > { %v173_v23 = vmul.f32 0.0625, %v172_v22  ;;  %v174_v24 = vmul.f32 %v161_v21, %v161_v21  ;;  %v177_v28 = vsub.f32 %v148_v0, %v161_v21  ;;  %v178_v29 = vsub.f32 %v149_v1, %v161_v21 }
  0x23   : > { %v175_v25 = vsub.f32 %v173_v23, %v174_v24 }
  0x25   : > { %v176_v26 = vmax.f32 %v175_v25, 0.0 }
  0x27   : > { %v179_v27 = vadd.f32 1e-05, %v176_v26 }
  0x29   : > { %311 = vrsqrt.f32 %v179_v27 }
  0x36   : > { %v312_v30 = vpop.eup %311 }
  0x37   : > { %v181_v31 = vmul.f32 %v312_v30, %v177_v28  ;;  %v182_v32 = vmul.f32 %v312_v30, %v178_v29 }
  0x39   : > { %vm183_vm1 = vcmp.gt.f32.partialorder %v181_v31, 0.0  ;;  %v185_v33 = vmul.f32 0.2, %v181_v31  ;;  %vm184_vm2 = vcmp.gt.f32.partialorder %v182_v32, 0.0  ;;  %v186_v34 = vmul.f32 0.2, %v182_v32 }
  0x3b   : > { %v187_v35 = vsel %vm183_vm1, %v181_v31, %v185_v33  ;;  %v188_v36 = vsel %vm184_vm2, %v182_v32, %v186_v34 }
  0x3c   : > { %189 = vst.msk [vmem:[%s147_s16] sm:$0xff] %vm150_vm0, %v187_v35  ;;  %190 = vst.msk [vmem:[%s147_s16 + $0x8] sm:$0xff] %vm150_vm0, %v188_v36 }
  0x3d PF: > { %s11_s8 = sadd.s32 1, %s335_s8   ;;  %s395_s6 = smov %s331_s7 }
  0x3e   : > { %p8_p5 = scmp.ge.s32.totalorder %s11_s8, 4   ;;  %s396_s7 = smov %s398_s9 }
  0x40   :  { %10 = sbr.rel (!%p8_p5) target bundleno = 2 (0x2), region = 54 }

// kernel: _forward.14
= control target key start
LH: loop header
LB: loop body
LE: loop exit
PB: predicated region body
PF: predicated region fallthrough
CT: control target
= control target key end

     0   :  { %s348_s6 = smov 0   ;;  %s350_s7 = smov 0   ;;  %s394_s0 = inlined_call_operand.vmem [shape: f32[2,9,64], index: 0, kind: input, shape index: {}]   ;;  %s395_s1 = inlined_call_operand.vmem [shape: f32[2,9,64], index: 1, kind: output, shape index: {}]  }
   0x1   :  { %s352_s8 = smov 0  }
   0x2 LB: > { %s23_s9 = sadd.s32 1, %s332_s7  ;;  %p279_p0 = scmp.ge.s32.totalorder %s336_s8, 1  ;;  %s336_s8 = sphi %s352_s8, %s11_s8   ;;  %s332_s7 = sphi %s350_s7, %s397_s7   ;;  %s328_s6 = sphi %s348_s6, %s396_s6  }
   0x3   : > { %p25_p1 = scmp.ge.s32.totalorder %s23_s9, 2  ;;  %p106_p2 = scmp.lt.s32.totalorder %s336_s8, 3 }
   0x5   : > { %s399_s9 = smov (%p25_p1, %s23_s9), 0  ;;  %p107_p3 = pnand %p279_p0, %p106_p2 }
   0x6   : > { %p132_p4 = scmp.lt.s32.totalorder (!%p107_p3), %s328_s6, 1 }
   0x7   : > { %110 = sbr.rel (%p107_p3) target bundleno = 62 (0x3e), region = 24 }
   0xc   : > { %s401_s6 = smov (!%p132_p4, %s328_s6), 1  ;;  %vm150_vm0 = vcmask 523264   ;;  %vm152_vm1 = vcmask 516096  }
   0xd   : > { %s286_s10 = sshll.u32 %s401_s6, 4 }
   0xe   : > { %s139_s13 = scalar_lea.vmem %s394_s0, %s286_s10  ;;  %s147_s16 = scalar_lea.vmem %s395_s1, %s286_s10 }
   0xf   : > { %v148_v0 = vld [vmem:[%s139_s13] sm:$0xff]  ;;  %v149_v1 = vld [vmem:[%s139_s13 + $0x8] sm:$0x1] }
  0x10   : > { %v151_v2 = vsel %vm150_vm0, %v148_v0, 0.0  ;;  %v153_v3 = vsel %vm152_vm1, %v149_v1, 0.0  ;;  %v163_v4 = vmul.f32 %v148_v0, %v148_v0  ;;  %v164_v5 = vmul.f32 %v149_v1, %v149_v1 }
  0x11   : > { %v154_v6 = vadd.f32 %v153_v3, %v151_v2 }
  0x12   : > { %v165_v7 = vsel %vm150_vm0, %v163_v4, 0.0  ;;  %v166_v8 = vsel %vm152_vm1, %v164_v5, 0.0 }
  0x13   : > { %v155_v9 = vrot.slane %v154_v6, 4  ;;  %v167_v10 = vadd.f32 %v166_v8, %v165_v7 }
  0x15   : > { %v156_v11 = vadd.f32 %v155_v9, %v154_v6  ;;  %v168_v12 = vrot.slane %v167_v10, 4 }
  0x17   : > { %v157_v13 = vrot.slane %v156_v11, 2  ;;  %v169_v14 = vadd.f32 %v168_v12, %v167_v10 }
  0x19   : > { %v158_v15 = vadd.f32 %v157_v13, %v156_v11  ;;  %v170_v16 = vrot.slane %v169_v14, 2 }
  0x1b   : > { %v159_v17 = vrot.slane %v158_v15, 1  ;;  %v171_v18 = vadd.f32 %v170_v16, %v169_v14 }
  0x1d   : > { %v160_v19 = vadd.f32 %v159_v17, %v158_v15  ;;  %v172_v20 = vrot.slane %v171_v18, 1 }
  0x1f   : > { %v162_v21 = vmul.f32 0.11111111, %v160_v19  ;;  %v173_v22 = vadd.f32 %v172_v20, %v171_v18 }
  0x21   : > { %v174_v23 = vmul.f32 0.11111111, %v173_v22  ;;  %v175_v24 = vmul.f32 %v162_v21, %v162_v21  ;;  %v178_v28 = vsub.f32 %v148_v0, %v162_v21  ;;  %v179_v29 = vsub.f32 %v149_v1, %v162_v21 }
  0x23   : > { %v176_v25 = vsub.f32 %v174_v23, %v175_v24 }
  0x25   : > { %v177_v26 = vmax.f32 %v176_v25, 0.0 }
  0x27   : > { %v180_v27 = vadd.f32 1e-05, %v177_v26 }
  0x29   : > { %312 = vrsqrt.f32 %v180_v27 }
  0x36   : > { %v313_v30 = vpop.eup %312 }
  0x37   : > { %v182_v31 = vmul.f32 %v313_v30, %v178_v28  ;;  %v183_v32 = vmul.f32 %v313_v30, %v179_v29 }
  0x39   : > { %vm184_vm2 = vcmp.gt.f32.partialorder %v182_v31, 0.0  ;;  %v186_v33 = vmul.f32 0.2, %v182_v31  ;;  %vm185_vm3 = vcmp.gt.f32.partialorder %v183_v32, 0.0  ;;  %v187_v34 = vmul.f32 0.2, %v183_v32 }
  0x3b   : > { %v188_v35 = vsel %vm184_vm2, %v182_v31, %v186_v33  ;;  %v189_v36 = vsel %vm185_vm3, %v183_v32, %v187_v34 }
  0x3c   : > { %190 = vst.msk [vmem:[%s147_s16] sm:$0xff] %vm150_vm0, %v188_v35 }
  0x3d   : > { %191 = vst.msk [vmem:[%s147_s16 + $0x8] sm:$0x1] %vm152_vm1, %v189_v36 }
  0x3e PF: > { %s11_s8 = sadd.s32 1, %s336_s8   ;;  %s396_s6 = smov %s332_s7 }
  0x3f   : > { %p8_p5 = scmp.ge.s32.totalorder %s11_s8, 4   ;;  %s397_s7 = smov %s399_s9 }
  0x41   :  { %10 = sbr.rel (!%p8_p5) target bundleno = 2 (0x2), region = 54 }

// kernel: _forward.13
= control target key start
LH: loop header
LB: loop body
LE: loop exit
PB: predicated region body
PF: predicated region fallthrough
CT: control target
= control target key end

     0   :  { %s709_s1 = inlined_call_operand.vmem [shape: bf16[512,128], index: 1, kind: input, shape index: {}]   ;;  %s710_s0 = inlined_call_operand.vmem [shape: bf16[24,512], index: 0, kind: input, shape index: {}]   ;;  %s711_s2 = inlined_call_operand.vmem [shape: f32[24,128], index: 2, kind: output, shape index: {}]  }
   0x1   :  { %v529_v0 = vld [vmem:[%s709_s1 + $0x78] sm:$0xff]   ;;  %v533_v4 = vld [vmem:[%s709_s1 + $0x70] sm:$0xff]   ;;  %v537_v8 = vld [vmem:[%s709_s1 + $0x68] sm:$0xff]  }
   0x2   :  { %v530_v1 = vld [vmem:[%s709_s1 + $0xf8] sm:$0xff]   ;;  %473 = vmatprep.subr.bf16.mxu0 %v529_v0  ;;  %v534_v5 = vld [vmem:[%s709_s1 + $0xf0] sm:$0xff]   ;;  %v538_v9 = vld [vmem:[%s709_s1 + $0xe8] sm:$0xff]  }
   0x3   :  { %v531_v2 = vld [vmem:[%s709_s1 + $0x38] sm:$0xff]   ;;  %501 = vmatprep.subr.bf16.mxu1 %v530_v1  ;;  %v535_v6 = vld [vmem:[%s709_s1 + $0x30] sm:$0xff]   ;;  %v539_v10 = vld [vmem:[%s709_s1 + $0x28] sm:$0xff]  }
   0x4   :  { %v532_v3 = vld [vmem:[%s709_s1 + $0xb8] sm:$0xff]   ;;  %474 = vmatpush3.bf16.msra.mxu0 %v531_v2  ;;  %v536_v7 = vld [vmem:[%s709_s1 + $0xb0] sm:$0xff]   ;;  %v540_v11 = vld [vmem:[%s709_s1 + $0xa8] sm:$0xff]  }
   0x5   :  { %502 = vmatpush3.bf16.msra.mxu1 %v532_v3  ;;  %475 = vmatprep.subr.bf16.mxu0 %v533_v4  ;;  %v541_v12 = vld [vmem:[%s709_s1 + $0x60] sm:$0xff]   ;;  %v545_v16 = vld [vmem:[%s709_s1 + $0x58] sm:$0xff]   ;;  %v549_v20 = vld [vmem:[%s709_s1 + $0x50] sm:$0xff]  }
   0x6   :  { %503 = vmatprep.subr.bf16.mxu1 %v534_v5  ;;  %v542_v13 = vld [vmem:[%s709_s1 + $0xe0] sm:$0xff]   ;;  %v546_v17 = vld [vmem:[%s709_s1 + $0xd8] sm:$0xff]   ;;  %v550_v21 = vld [vmem:[%s709_s1 + $0xd0] sm:$0xff]  }
   0x7   :  { %v543_v14 = vld [vmem:[%s709_s1 + $0x20] sm:$0xff]   ;;  %v547_v18 = vld [vmem:[%s709_s1 + $0x18] sm:$0xff]   ;;  %v551_v22 = vld [vmem:[%s709_s1 + $0x10] sm:$0xff]  }
   0x8   :  { %476 = vmatpush3.bf16.msra.mxu0 %v535_v6  ;;  %v544_v15 = vld [vmem:[%s709_s1 + $0xa0] sm:$0xff]   ;;  %v548_v19 = vld [vmem:[%s709_s1 + $0x98] sm:$0xff]   ;;  %v552_v23 = vld [vmem:[%s709_s1 + $0x90] sm:$0xff]  }
   0x9   :  { %504 = vmatpush3.bf16.msra.mxu1 %v536_v7  ;;  %477 = vmatprep.subr.bf16.mxu0 %v537_v8  ;;  %v553_v24 = vld [vmem:[%s709_s1 + $0x48] sm:$0xff]   ;;  %v557_v28 = vld [vmem:[%s709_s1 + $0x40] sm:$0xff]  }
   0xa   :  { %505 = vmatprep.subr.bf16.mxu1 %v538_v9  ;;  %v554_v25 = vld [vmem:[%s709_s1 + $0xc8] sm:$0xff]   ;;  %v558_v29 = vld [vmem:[%s709_s1 + $0xc0] sm:$0xff]  }
   0xb   :  { %v555_v26 = vld [vmem:[%s709_s1 + $0x8] sm:$0xff]   ;;  %v559_v30 = vld [vmem:[%s709_s1] sm:$0xff]  }
   0xc   :  { %478 = vmatpush3.bf16.msra.mxu0 %v539_v10  ;;  %v556_v27 = vld [vmem:[%s709_s1 + $0x88] sm:$0xff]   ;;  %v560_v31 = vld [vmem:[%s709_s1 + $0x80] sm:$0xff]  }
   0xd   :  { %506 = vmatpush3.bf16.msra.mxu1 %v540_v11  ;;  %479 = vmatprep.subr.bf16.mxu0 %v541_v12  ;;  %v561_v32 = vld [vmem:[%s710_s0] ss:$16 sps:$4 sm:$0xff]   ;;  %v563_v33 = vld [vmem:[%s710_s0 + $0x4] ss:$16 sps:$4 sm:$0xff]   ;;  %v564_v34 = vld [vmem:[%s710_s0 + $0x8] ss:$16 sps:$4 sm:$0xff]  }
   0xe   :  { %507 = vmatprep.subr.bf16.mxu1 %v542_v13  ;;  %v566_v35 = vld [vmem:[%s710_s0 + $0xc] ss:$16 sps:$4 sm:$0xff]   ;;  %v26_v36 = vld [vmem:[%s710_s0 + $0x20] sm:$0xff]  ;;  %350 = vmatprep.mubr.bf16.mxu0 %v563_v33 }
   0xf   :  { %v438_v37 = vcombine.high %v26_v36, %v26_v36  ;;  %v27_v38 = vld [vmem:[%s710_s0 + $0x28] sm:$0xff]  ;;  %398 = vmatprep.mubr.bf16.mxu1 %v566_v35  ;;  %v437_v40 = vcombine.low %v26_v36, %v26_v36 }
  0x10   :  { %480 = vmatpush3.bf16.msra.mxu0 %v543_v14  ;;  %v440_v39 = vcombine.high %v27_v38, %v27_v38  ;;  %v439_v41 = vcombine.low %v27_v38, %v27_v38 }
  0x11   :  { %508 = vmatpush3.bf16.msra.mxu1 %v544_v15  ;;  %481 = vmatprep.subr.bf16.mxu0 %v545_v16 }
  0x12   :  { %509 = vmatprep.subr.bf16.mxu1 %v546_v17 }
  0x14   :  { %482 = vmatpush3.bf16.msra.mxu0 %v547_v18 }
  0x15   :  { %510 = vmatpush3.bf16.msra.mxu1 %v548_v19  ;;  %483 = vmatprep.subr.bf16.mxu0 %v549_v20 }
  0x16   :  { %511 = vmatprep.subr.bf16.mxu1 %v550_v21 }
  0x18   :  { %484 = vmatpush3.bf16.msra.mxu0 %v551_v22 }
  0x19   :  { %512 = vmatpush3.bf16.msra.mxu1 %v552_v23  ;;  %485 = vmatprep.subr.bf16.mxu0 %v553_v24 }
  0x1a   :  { %513 = vmatprep.subr.bf16.mxu1 %v554_v25 }
  0x1c   :  { %486 = vmatpush3.bf16.msra.mxu0 %v555_v26 }
  0x1d   :  { %514 = vmatpush3.bf16.msra.mxu1 %v556_v27  ;;  %487 = vmatprep.subr.bf16.mxu0 %v557_v28 }
  0x1e   :  { %515 = vmatprep.subr.bf16.mxu1 %v558_v29 }
  0x20   :  { %488 = vmatpush3.bf16.msra.mxu0 %v559_v30 }
  0x21   :  { %516 = vmatpush3.bf16.msra.mxu1 %v560_v31 }
  0x23   :  { %351 = vmatmul.mubr.bf16.vlgmr.msra.gmra.mxu0 %v561_v32 }
  0x24   :  { %399 = vmatmul.mubr.bf16.vlgmr.msra.gmra.mxu1 %v564_v34  ;;  %358 = vmatprep.mubr.bf16.mxu0 %v438_v37 }
  0x25   :  { %406 = vmatprep.mubr.bf16.mxu1 %v440_v39 }
  0x2b   :  { %359 = vmatmul.mubr.bf16.gmra.mxu0 %v437_v40 }
  0x2c   :  { %407 = vmatmul.mubr.bf16.gmra.mxu1 %v439_v41 }
  0xe3   :  { %v489_v42 = vpop.f32.mrf.mxu0 }
  0xe4   :  { %v517_v43 = vpop.f32.mrf.mxu1 }
  0xe5   :  { %v490_v44 = vpop.f32.mrf.mxu0 }
  0xe6   :  { %v491_v45 = vadd.f32 %v490_v44, %v489_v42  ;;  %v518_v46 = vpop.f32.mrf.mxu1 }
  0xe7   :  { %v519_v47 = vadd.f32 %v518_v46, %v517_v43  ;;  %v492_v48 = vpop.f32.mrf.mxu0 }
  0xe8   :  { %v520_v49 = vpop.f32.mrf.mxu1 }
  0xe9   :  { %v401_v50 = vadd.f32 %v519_v47, %v491_v45  ;;  %v493_v51 = vpop.f32.mrf.mxu0 }
  0xea   :  { %v494_v52 = vadd.f32 %v493_v51, %v492_v48  ;;  %v521_v53 = vpop.f32.mrf.mxu1 }
  0xeb   :  { %426 = vst [vmem:[%s711_s2] sm:$0xff] %v401_v50  ;;  %v522_v54 = vadd.f32 %v521_v53, %v520_v49  ;;  %v495_v55 = vpop.f32.mrf.mxu0 }
  0xec   :  { %v523_v56 = vpop.f32.mrf.mxu1 }
  0xed   :  { %v404_v57 = vadd.f32 %v522_v54, %v494_v52  ;;  %v496_v58 = vpop.f32.mrf.mxu0 }
  0xee   :  { %v497_v59 = vadd.f32 %v496_v58, %v495_v55  ;;  %v524_v60 = vpop.f32.mrf.mxu1 }
  0xef   :  { %427 = vst [vmem:[%s711_s2 + $0x8] sm:$0xff] %v404_v57  ;;  %v525_v61 = vadd.f32 %v524_v60, %v523_v56  ;;  %v498_v62 = vpop.f32.mrf.mxu0 }
  0xf0   :  { %v526_v63 = vpop.f32.mrf.mxu1 }
  0xf1   :  { %v409_v0 = vadd.f32 %v525_v61, %v497_v59  ;;  %v499_v1 = vpop.f32.mrf.mxu0 }
  0xf2   :  { %v527_v2 = vpop.f32.mrf.mxu1 }
  0xf3   :  { %428 = vst [vmem:[%s711_s2 + $0x10] sm:$0xff] %v409_v0 }

// kernel: _forward.15
= control target key start
LH: loop header
LB: loop body
LE: loop exit
PB: predicated region body
PF: predicated region fallthrough
CT: control target
= control target key end

     0   :  { %s940_s12 = smov 0   ;;  %s942_s13 = smov 0   ;;  %s1023_s0 = inlined_call_operand.vmem [shape: bf16[8,1024], index: 0, kind: input, shape index: {}]   ;;  %s1024_s1 = inlined_call_operand.vmem [shape: bf16[1024,128], index: 1, kind: input, shape index: {}]   ;;  %s1025_s2 = inlined_call_operand.vmem [shape: f32[1,128], index: 2, kind: input, shape index: {}]   ;;  %s1026_s3 = inlined_call_operand.vmem [shape: f32[8,128], index: 3, kind: output, shape index: {}]  }
   0x1   :  { %s944_s14 = smov 0  }
   0x2 LB: > { %s25_s15 = sadd.s32 1, %s913_s13  ;;  %p743_p0 = scmp.ge.s32.totalorder %s917_s14, 1  ;;  %s917_s14 = sphi %s944_s14, %s13_s14   ;;  %s913_s13 = sphi %s942_s13, %s1028_s13   ;;  %s909_s12 = sphi %s940_s12, %s1027_s12  }
   0x3   : > { %p26_p1 = scmp.ge.s32.totalorder %s25_s15, 2  ;;  %p189_p2 = scmp.lt.s32.totalorder %s917_s14, 3 }
   0x5   : > { %s1030_s15 = smov (%p26_p1, %s25_s15), 0  ;;  %p190_p3 = pnand %p743_p0, %p189_p2 }
   0x6   : > { %s744_s16 = sshll.u32 (!%p190_p3), %s909_s12, 2  ;;  %s746_s17 = sshll.u32 (!%p190_p3), %s909_s12, 6 }
   0x7   : > { %193 = sbr.rel (%p190_p3) target bundleno = 269 (0x10d), region = 32  ;;  %p233_p4 = scmp.lt.s32.totalorder (!%p190_p3), %s744_s16, 7 }
   0x8   : > { %p241_p5 = scmp.lt.s32.totalorder (!%p190_p3), %s746_s17, 127  ;;  %p748_p6 = scmp.ne.s32.totalorder (!%p190_p3), %s909_s12, 0 }
   0xc   : > { %s1032_s16 = smov (!%p233_p4, %s744_s16), 7  ;;  %s1034_s17 = smov (!%p241_p5, %s746_s17), 127 }
   0xd   : > { %s745_s18 = sshll.u32 %s1032_s16, 2  ;;  %s747_s22 = sshll.u32 %s1034_s17, 2 }
   0xe   : > { %s965_s21 = scalar_lea.vmem %s1023_s0, %s745_s18  ;;  %s970_s25 = scalar_lea.vmem %s1024_s1, %s747_s22 }
   0xf   : > { %263 = sbr.rel (%p748_p6) target bundleno = 22 (0x16), region = 36 }
  0x14   : > { %v919_v0 = vmov 0.0  }
  0x15   : > { %264 = vst [vmem:[#allocation2] sm:$0xff] %v919_v0 }
  0x16 PF: > { %v859_v1 = vld [vmem:[%s970_s25 + $0x78] sm:$0xff]   ;;  %v863_v5 = vld [vmem:[%s970_s25 + $0x70] sm:$0xff]   ;;  %v867_v9 = vld [vmem:[%s970_s25 + $0x68] sm:$0xff]   ;;  %p785_p7 = scmp.ne.s32.totalorder %s909_s12, 1 }
  0x17   : > { %v860_v2 = vld [vmem:[%s970_s25 + $0xf8] sm:$0xff]   ;;  %790 = vmatprep.subr.bf16.mxu0 %v859_v1  ;;  %v864_v6 = vld [vmem:[%s970_s25 + $0xf0] sm:$0xff]   ;;  %v868_v10 = vld [vmem:[%s970_s25 + $0xe8] sm:$0xff]  }
  0x18   : > { %v861_v3 = vld [vmem:[%s970_s25 + $0x38] sm:$0xff]   ;;  %812 = vmatprep.subr.bf16.mxu1 %v860_v2  ;;  %v865_v7 = vld [vmem:[%s970_s25 + $0x30] sm:$0xff]   ;;  %v869_v11 = vld [vmem:[%s970_s25 + $0x28] sm:$0xff]  }
  0x19   : > { %v862_v4 = vld [vmem:[%s970_s25 + $0xb8] sm:$0xff]   ;;  %791 = vmatpush3.bf16.msra.mxu0 %v861_v3  ;;  %v866_v8 = vld [vmem:[%s970_s25 + $0xb0] sm:$0xff]   ;;  %v870_v12 = vld [vmem:[%s970_s25 + $0xa8] sm:$0xff]  }
  0x1a   : > { %813 = vmatpush3.bf16.msra.mxu1 %v862_v4  ;;  %792 = vmatprep.subr.bf16.mxu0 %v863_v5  ;;  %v871_v13 = vld [vmem:[%s970_s25 + $0x60] sm:$0xff]   ;;  %v875_v17 = vld [vmem:[%s970_s25 + $0x58] sm:$0xff]   ;;  %v879_v21 = vld [vmem:[%s970_s25 + $0x50] sm:$0xff]  }
  0x1b   : > { %814 = vmatprep.subr.bf16.mxu1 %v864_v6  ;;  %v872_v14 = vld [vmem:[%s970_s25 + $0xe0] sm:$0xff]   ;;  %v876_v18 = vld [vmem:[%s970_s25 + $0xd8] sm:$0xff]   ;;  %v880_v22 = vld [vmem:[%s970_s25 + $0xd0] sm:$0xff]  }
  0x1c   : > { %v873_v15 = vld [vmem:[%s970_s25 + $0x20] sm:$0xff]   ;;  %v877_v19 = vld [vmem:[%s970_s25 + $0x18] sm:$0xff]   ;;  %v881_v23 = vld [vmem:[%s970_s25 + $0x10] sm:$0xff]  }
  0x1d   : > { %793 = vmatpush3.bf16.msra.mxu0 %v865_v7  ;;  %v874_v16 = vld [vmem:[%s970_s25 + $0xa0] sm:$0xff]   ;;  %v878_v20 = vld [vmem:[%s970_s25 + $0x98] sm:$0xff]   ;;  %v882_v24 = vld [vmem:[%s970_s25 + $0x90] sm:$0xff]  }
  0x1e   : > { %815 = vmatpush3.bf16.msra.mxu1 %v866_v8  ;;  %794 = vmatprep.subr.bf16.mxu0 %v867_v9  ;;  %v883_v25 = vld [vmem:[%s970_s25 + $0x48] sm:$0xff]   ;;  %v887_v29 = vld [vmem:[%s970_s25 + $0x40] sm:$0xff]  }
  0x1f   : > { %816 = vmatprep.subr.bf16.mxu1 %v868_v10  ;;  %v884_v26 = vld [vmem:[%s970_s25 + $0xc8] sm:$0xff]   ;;  %v888_v30 = vld [vmem:[%s970_s25 + $0xc0] sm:$0xff]  }
  0x20   : > { %v885_v27 = vld [vmem:[%s970_s25 + $0x8] sm:$0xff]   ;;  %v889_v31 = vld [vmem:[%s970_s25] sm:$0xff]  }
  0x21   : > { %795 = vmatpush3.bf16.msra.mxu0 %v869_v11  ;;  %v886_v28 = vld [vmem:[%s970_s25 + $0x88] sm:$0xff]   ;;  %v890_v32 = vld [vmem:[%s970_s25 + $0x80] sm:$0xff]  }
  0x22   : > { %817 = vmatpush3.bf16.msra.mxu1 %v870_v12  ;;  %796 = vmatprep.subr.bf16.mxu0 %v871_v13  ;;  %v266_v33 = vld [vmem:[%s965_s21] sm:$0xff]  ;;  %v267_v34 = vld [vmem:[%s965_s21 + $0x8] sm:$0xff] }
  0x23   : > { %818 = vmatprep.subr.bf16.mxu1 %v872_v14  ;;  %v749_v35 = vcombine.low %v266_v33, %v266_v33  ;;  %v750_v36 = vcombine.high %v266_v33, %v266_v33  ;;  %v751_v37 = vcombine.low %v267_v34, %v267_v34  ;;  %v752_v38 = vcombine.high %v267_v34, %v267_v34  ;;  %v265_v45 = vld [vmem:[#allocation2] sm:$0xff] }
  0x25   : > { %797 = vmatpush3.bf16.msra.mxu0 %v873_v15  ;;  %570 = vmatprep.mubr.bf16.mxu0 %v750_v36 }
  0x26   : > { %819 = vmatpush3.bf16.msra.mxu1 %v874_v16  ;;  %798 = vmatprep.subr.bf16.mxu0 %v875_v17 }
  0x27   : > { %820 = vmatprep.subr.bf16.mxu1 %v876_v18  ;;  %610 = vmatprep.mubr.bf16.mxu1 %v752_v38 }
  0x29   : > { %799 = vmatpush3.bf16.msra.mxu0 %v877_v19 }
  0x2a   : > { %821 = vmatpush3.bf16.msra.mxu1 %v878_v20  ;;  %800 = vmatprep.subr.bf16.mxu0 %v879_v21 }
  0x2b   : > { %822 = vmatprep.subr.bf16.mxu1 %v880_v22 }
  0x2d   : > { %801 = vmatpush3.bf16.msra.mxu0 %v881_v23 }
  0x2e   : > { %823 = vmatpush3.bf16.msra.mxu1 %v882_v24  ;;  %802 = vmatprep.subr.bf16.mxu0 %v883_v25 }
  0x2f   : > { %824 = vmatprep.subr.bf16.mxu1 %v884_v26 }
  0x31   : > { %803 = vmatpush3.bf16.msra.mxu0 %v885_v27 }
  0x32   : > { %825 = vmatpush3.bf16.msra.mxu1 %v886_v28  ;;  %804 = vmatprep.subr.bf16.mxu0 %v887_v29 }
  0x33   : > { %826 = vmatprep.subr.bf16.mxu1 %v888_v30 }
  0x35   : > { %805 = vmatpush3.bf16.msra.mxu0 %v889_v31 }
  0x36   : > { %827 = vmatpush3.bf16.msra.mxu1 %v890_v32 }
  0x38   : > { %571 = vmatmul.mubr.bf16.vlgmr.msra.gmra.mxu0 %v749_v35 }
  0x39   : > { %611 = vmatmul.mubr.bf16.vlgmr.msra.gmra.mxu1 %v751_v37 }
  0xf8   : > { %v806_v39 = vpop.f32.mrf.mxu0 }
  0xf9   : > { %v828_v40 = vpop.f32.mrf.mxu1 }
  0xfa   : > { %v807_v41 = vpop.f32.mrf.mxu0 }
  0xfb   : > { %v829_v42 = vpop.f32.mrf.mxu1  ;;  %v808_v43 = vadd.f32 %v807_v41, %v806_v39 }
  0xfc   : > { %v830_v44 = vadd.f32 %v829_v42, %v828_v40  ;;  %v809_v46 = vpop.f32.mrf.mxu0 }
  0xfd   : > { %v831_v47 = vpop.f32.mrf.mxu1 }
  0xfe   : > { %v613_v48 = vadd.f32 %v830_v44, %v808_v43  ;;  %v810_v49 = vpop.f32.mrf.mxu0  ;;  %623 = sbr.rel (%p785_p7) target bundleno = 269 (0x10d), region = 40 }
  0xff   : > { %v832_v50 = vpop.f32.mrf.mxu1 }
 0x100   : > { %v618_v51 = vadd.f32 %v613_v48, %v265_v45 }
 0x102   : > { %619 = vst [vmem:[#allocation2] sm:$0xff] %v618_v51 }
 0x103   : > { %v786_v53 = vld [vmem:[%s1025_s2] ss:$0 sm:$0xff] }
 0x109   : > { %v624_v52 = vld [vmem:[#allocation2] sm:$0xff] }
 0x10a   : > { %v632_v54 = vadd.f32 %v786_v53, %v624_v52 }
 0x10c   : > { %633 = vst [vmem:[%s1026_s3] sm:$0xff] %v632_v54 }
 0x10d PF: > { %s13_s14 = sadd.s32 1, %s917_s14   ;;  %s1027_s12 = smov %s913_s13 }
 0x10e   : > { %p10_p8 = scmp.ge.s32.totalorder %s13_s14, 4   ;;  %s1028_s13 = smov %s1030_s15 }
 0x110   :  { %12 = sbr.rel (!%p10_p8) target bundleno = 2 (0x2), region = 76 }

</bundles_post_ra>
